<compile_context>
chip_gen: v6e
topology: v6e:2x2x1
jax: 0.10.0
libtpu: 0.0.40
codegen_flags: <defaults>
</compile_context>

<pallas_src>
import functools

import jax
import jax.numpy as jnp
from jax import lax
from jax.experimental import pallas as pl
from jax.experimental.pallas import tpu as pltpu


def _chain_kernel(masks_ref, x_ref, *rest, W, pad, residual_flags):
    """Fused DoubleConv chain.

    masks_ref : (9, S)  f32  per-tap validity masks (row/col wrap masking)
    x_ref     : (Cin, S) f32 activation, S = N*H*W (spatial flattened on lanes)
    rest      : per block [w1f (Cmid,Cin), b1 (Cmid,1), w2f (Cout,9*Cmid),
                           b2 (Cout,1)] ... , then o_ref (Cout_last, S)
    """
    o_ref = rest[-1]
    wrefs = rest[:-1]
    n_blocks = len(residual_flags)
    S = x_ref.shape[1]

    a = x_ref[...]
    for b in range(n_blocks):
        w1_ref, b1_ref, w2_ref, b2_ref = wrefs[4 * b:4 * b + 4]
        cmid = w1_ref.shape[0]

        # ---- conv1x1 (BN scale pre-folded into w1) + bias + ReLU ----
        h = jnp.dot(w1_ref[...], a, preferred_element_type=jnp.float32)
        h = jnp.maximum(h + b1_ref[...], 0.0)                      # (Cmid, S)

        # ---- conv3x3, padding=1, as a single im2col matmul ----
        # Pad the flattened spatial (lane) axis with `pad` zeros on each side
        # (pad is a multiple of 128 so the concat pieces stay lane-aligned),
        # take the 9 statically shifted slices, and mask row/col wrap-around.
        zpad = jnp.zeros((cmid, pad), jnp.float32)
        hp = jnp.concatenate([zpad, h, zpad], axis=-1)             # (Cmid, S+2*pad)
        taps = []
        for ky in range(3):
            for kx in range(3):
                off = (ky - 1) * W + (kx - 1)
                t = hp[:, pad + off: pad + off + S]                # (Cmid, S)
                m = masks_ref[ky * 3 + kx: ky * 3 + kx + 1, :]     # (1, S)
                taps.append(t * m)
        cols = jnp.concatenate(taps, axis=0)                       # (9*Cmid, S)

        y = jnp.dot(w2_ref[...], cols, preferred_element_type=jnp.float32)
        y = jnp.maximum(y + b2_ref[...], 0.0)                      # (Cout, S)

        if residual_flags[b]:                                      # x + layers(x)
            y = y + a
        a = y

    o_ref[...] = a.astype(o_ref.dtype)


def _make_tap_masks(N, H, W):
    """(9, N*H*W) f32 masks: 1 where the 3x3 tap stays inside its image."""
    S = N * H * W
    s = jnp.arange(S, dtype=jnp.int32)
    w_idx = s % W
    h_idx = (s // W) % H
    masks = []
    for ky in range(3):
        for kx in range(3):
            dy, dx = ky - 1, kx - 1
            ok = jnp.ones((S,), bool)
            if dy == -1:
                ok = ok & (h_idx > 0)
            if dy == 1:
                ok = ok & (h_idx < H - 1)
            if dx == -1:
                ok = ok & (w_idx > 0)
            if dx == 1:
                ok = ok & (w_idx < W - 1)
            masks.append(ok.astype(jnp.float32))
    return jnp.stack(masks, axis=0)


def double_conv_chain(x_nchw, chain_params):
    """Run the whole DoubleConv chain in one fused pallas_call (NCHW in/out)."""
    N, Cin, H, W = x_nchw.shape
    S = N * H * W
    pad = ((W + 1 + 127) // 128) * 128          # lane-aligned halo padding

    # NCHW -> (C, N*H*W): channels on sublanes, flattened spatial on lanes.
    x = jnp.transpose(x_nchw, (1, 0, 2, 3)).reshape(Cin, S)
    masks = _make_tap_masks(N, H, W)

    flat_w = []
    for (w1f, b1f, w2f, b2f, _) in chain_params:
        flat_w += [w1f, b1f, w2f, b2f]
    cout_last = chain_params[-1][2].shape[0]

    kernel = functools.partial(
        _chain_kernel,
        W=W,
        pad=pad,
        residual_flags=tuple(p[4] for p in chain_params),
    )
    vmem_spec = pl.BlockSpec(memory_space=pltpu.MemorySpace.VMEM)
    y = pl.pallas_call(
        kernel,
        out_shape=jax.ShapeDtypeStruct((cout_last, S), x.dtype),
        in_specs=[vmem_spec] * (2 + len(flat_w)),
        out_specs=vmem_spec,
    )(masks, x, *flat_w)

    # (Cout, N*H*W) -> NCHW
    return jnp.transpose(y.reshape(cout_last, N, H, W), (1, 0, 2, 3))


def init_chain_params(key, n, cin, cout, res=True, eps=1e-5):
    """Deterministic params for n DoubleConv blocks, BN folded into weights."""
    params = []
    for _ in range(n):
        cmid = cout // 2
        key, k1, k2 = jax.random.split(key, 3)
        # Conv weights (deterministic scaled normals), stored as:
        #   w1: (Cmid, Cin)            (== PyTorch (cout, cin) for the 1x1)
        #   w2: (3, 3, Cmid, Cout)     (== PyTorch (cout, cin, kh, kw) permuted)
        w1 = jax.random.normal(k1, (cmid, cin), jnp.float32) / jnp.sqrt(float(cin))
        w2 = jax.random.normal(k2, (3, 3, cmid, cout), jnp.float32) / jnp.sqrt(9.0 * cmid)

        # Fresh BatchNorm2d (eval mode): gamma=1, beta=0, mean=0, var=1.
        def fold_bn(c):
            gamma = jnp.ones((c,), jnp.float32)
            beta = jnp.zeros((c,), jnp.float32)
            mean = jnp.zeros((c,), jnp.float32)
            var = jnp.ones((c,), jnp.float32)
            scale = gamma / jnp.sqrt(var + eps)
            shift = beta - mean * scale
            return scale, shift

        s1, sh1 = fold_bn(cmid)
        s2, sh2 = fold_bn(cout)

        # Fold BN scale into the conv weights (host side); keep shift as bias.
        w1f = w1 * s1[:, None]                                            # (Cmid, Cin)
        b1f = sh1[:, None]                                                # (Cmid, 1)
        w2f = jnp.transpose(w2, (3, 0, 1, 2)).reshape(cout, 9 * cmid) * s2[:, None]
        b2f = sh2[:, None]                                                # (Cout, 1)

        residual = (cin == cout) and res
        params.append((w1f, b1f, w2f, b2f, residual))
        cin = cout
    return params


def _ref_chain(x_nchw, chain_params):
    """Pure-JAX (lax.conv) reference with the same folded parameters."""
    x = x_nchw
    for (w1f, b1f, w2f, b2f, residual) in chain_params:
        cmid = w1f.shape[0]
        cout = w2f.shape[0]
        h = jnp.einsum('oi,nihw->nohw', w1f, x) + b1f.reshape(1, cmid, 1, 1)
        h = jnp.maximum(h, 0.0)
        w_oihw = jnp.transpose(w2f.reshape(cout, 3, 3, cmid), (0, 3, 1, 2))
        y = lax.conv_general_dilated(
            h, w_oihw, window_strides=(1, 1), padding=((1, 1), (1, 1)),
            dimension_numbers=('NCHW', 'OIHW', 'NCHW'))
        y = jnp.maximum(y + b2f.reshape(1, cout, 1, 1), 0.0)
        x = (y + x) if residual else y
    return x


if __name__ == "__main__":
    key = jax.random.PRNGKey(0)
    key, xkey = jax.random.split(key)

    N, Cin, H, W = 2, 4, 16, 16   # small NCHW input
    n_blocks, Cout = 2, 16        # block 0: 4->16 (no residual), block 1: 16->16 (residual)

    x = jax.random.normal(xkey, (N, Cin, H, W), jnp.float32)
    params = init_chain_params(key, n_blocks, Cin, Cout, res=True)

    y = double_conv_chain(x, params)
    jax.block_until_ready(y)
    assert y.shape == (N, Cout, H, W), y.shape

    # Correctness check against a pure-JAX reference.
    y_ref = _ref_chain(x, params)
    err = float(jnp.max(jnp.abs(y - y_ref)))
    assert err < 1e-2, f"max abs err vs reference: {err}"

    print("KERNEL_OK")
</pallas_src>

<mosaic_0001>
module attributes {stable_mosaic.version = 11 : i64} {
  func.func @_chain_kernel(%arg0: memref<9x512xf32, #tpu.memory_space<vmem>>, %arg1: memref<4x512xf32, #tpu.memory_space<vmem>>, %arg2: memref<8x4xf32, #tpu.memory_space<vmem>>, %arg3: memref<8x1xf32, #tpu.memory_space<vmem>>, %arg4: memref<16x72xf32, #tpu.memory_space<vmem>>, %arg5: memref<16x1xf32, #tpu.memory_space<vmem>>, %arg6: memref<8x16xf32, #tpu.memory_space<vmem>>, %arg7: memref<8x1xf32, #tpu.memory_space<vmem>>, %arg8: memref<16x72xf32, #tpu.memory_space<vmem>>, %arg9: memref<16x1xf32, #tpu.memory_space<vmem>>, %arg10: memref<16x512xf32, #tpu.memory_space<vmem>>) attributes {dimension_semantics = [], scalar_prefetch = 0 : i64, scratch_operands = 0 : i64, tpu.core_type = #tpu.core_type<tc>} {
    %c0 = arith.constant 0 : index
    %c0_0 = arith.constant 0 : index
    %0 = vector.load %arg1[%c0, %c0_0] : memref<4x512xf32, #tpu.memory_space<vmem>>, vector<4x512xf32>
    %c0_1 = arith.constant 0 : index
    %c0_2 = arith.constant 0 : index
    %1 = vector.load %arg2[%c0_1, %c0_2] : memref<8x4xf32, #tpu.memory_space<vmem>>, vector<8x4xf32>
    %cst = arith.constant dense<0.000000e+00> : vector<8x512xf32>
    %2 = tpu.matmul %1, %0, %cst {dimension_numbers = #tpu.dot_dimension_numbers<[1], [0], [0], [1], [0, 0, 1, 1], [], []>} : vector<8x4xf32>, vector<4x512xf32>, vector<8x512xf32> -> vector<8x512xf32>
    %c0_3 = arith.constant 0 : index
    %c0_4 = arith.constant 0 : index
    %3 = vector.load %arg3[%c0_3, %c0_4] : memref<8x1xf32, #tpu.memory_space<vmem>>, vector<8x1xf32>
    %4 = vector.broadcast %3 : vector<8x1xf32> to vector<8x512xf32>
    %5 = arith.addf %2, %4 : vector<8x512xf32>
    %cst_5 = arith.constant 0.000000e+00 : f32
    %6 = vector.broadcast %cst_5 : f32 to vector<8x512xf32>
    %7 = arith.maximumf %5, %6 : vector<8x512xf32>
    %cst_6 = arith.constant 0.000000e+00 : f32
    %8 = vector.broadcast %cst_6 : f32 to vector<8x128xf32>
    %9 = tpu.concatenate %8, %7, %8 in 1 : vector<8x128xf32>, vector<8x512xf32>, vector<8x128xf32> -> vector<8x768xf32>
    %10 = vector.extract_strided_slice %9 {offsets = [0, 111], sizes = [8, 512], strides = [1, 1]} : vector<8x768xf32> to vector<8x512xf32>
    %c0_7 = arith.constant 0 : index
    %c0_8 = arith.constant 0 : index
    %11 = vector.load %arg0[%c0_7, %c0_8] : memref<9x512xf32, #tpu.memory_space<vmem>>, vector<1x512xf32>
    %12 = vector.broadcast %11 : vector<1x512xf32> to vector<8x512xf32>
    %13 = arith.mulf %10, %12 : vector<8x512xf32>
    %14 = vector.extract_strided_slice %9 {offsets = [0, 112], sizes = [8, 512], strides = [1, 1]} : vector<8x768xf32> to vector<8x512xf32>
    %c1 = arith.constant 1 : index
    %c0_9 = arith.constant 0 : index
    %15 = vector.load %arg0[%c1, %c0_9] : memref<9x512xf32, #tpu.memory_space<vmem>>, vector<1x512xf32>
    %16 = vector.broadcast %15 : vector<1x512xf32> to vector<8x512xf32>
    %17 = arith.mulf %14, %16 : vector<8x512xf32>
    %18 = vector.extract_strided_slice %9 {offsets = [0, 113], sizes = [8, 512], strides = [1, 1]} : vector<8x768xf32> to vector<8x512xf32>
    %c2 = arith.constant 2 : index
    %c0_10 = arith.constant 0 : index
    %19 = vector.load %arg0[%c2, %c0_10] : memref<9x512xf32, #tpu.memory_space<vmem>>, vector<1x512xf32>
    %20 = vector.broadcast %19 : vector<1x512xf32> to vector<8x512xf32>
    %21 = arith.mulf %18, %20 : vector<8x512xf32>
    %22 = vector.extract_strided_slice %9 {offsets = [0, 127], sizes = [8, 512], strides = [1, 1]} : vector<8x768xf32> to vector<8x512xf32>
    %c3 = arith.constant 3 : index
    %c0_11 = arith.constant 0 : index
    %23 = vector.load %arg0[%c3, %c0_11] : memref<9x512xf32, #tpu.memory_space<vmem>>, vector<1x512xf32>
    %24 = vector.broadcast %23 : vector<1x512xf32> to vector<8x512xf32>
    %25 = arith.mulf %22, %24 : vector<8x512xf32>
    %26 = vector.extract_strided_slice %9 {offsets = [0, 128], sizes = [8, 512], strides = [1, 1]} : vector<8x768xf32> to vector<8x512xf32>
    %c4 = arith.constant 4 : index
    %c0_12 = arith.constant 0 : index
    %27 = vector.load %arg0[%c4, %c0_12] : memref<9x512xf32, #tpu.memory_space<vmem>>, vector<1x512xf32>
    %28 = vector.broadcast %27 : vector<1x512xf32> to vector<8x512xf32>
    %29 = arith.mulf %26, %28 : vector<8x512xf32>
    %30 = vector.extract_strided_slice %9 {offsets = [0, 129], sizes = [8, 512], strides = [1, 1]} : vector<8x768xf32> to vector<8x512xf32>
    %c5 = arith.constant 5 : index
    %c0_13 = arith.constant 0 : index
    %31 = vector.load %arg0[%c5, %c0_13] : memref<9x512xf32, #tpu.memory_space<vmem>>, vector<1x512xf32>
    %32 = vector.broadcast %31 : vector<1x512xf32> to vector<8x512xf32>
    %33 = arith.mulf %30, %32 : vector<8x512xf32>
    %34 = vector.extract_strided_slice %9 {offsets = [0, 143], sizes = [8, 512], strides = [1, 1]} : vector<8x768xf32> to vector<8x512xf32>
    %c6 = arith.constant 6 : index
    %c0_14 = arith.constant 0 : index
    %35 = vector.load %arg0[%c6, %c0_14] : memref<9x512xf32, #tpu.memory_space<vmem>>, vector<1x512xf32>
    %36 = vector.broadcast %35 : vector<1x512xf32> to vector<8x512xf32>
    %37 = arith.mulf %34, %36 : vector<8x512xf32>
    %38 = vector.extract_strided_slice %9 {offsets = [0, 144], sizes = [8, 512], strides = [1, 1]} : vector<8x768xf32> to vector<8x512xf32>
    %c7 = arith.constant 7 : index
    %c0_15 = arith.constant 0 : index
    %39 = vector.load %arg0[%c7, %c0_15] : memref<9x512xf32, #tpu.memory_space<vmem>>, vector<1x512xf32>
    %40 = vector.broadcast %39 : vector<1x512xf32> to vector<8x512xf32>
    %41 = arith.mulf %38, %40 : vector<8x512xf32>
    %42 = vector.extract_strided_slice %9 {offsets = [0, 145], sizes = [8, 512], strides = [1, 1]} : vector<8x768xf32> to vector<8x512xf32>
    %c8 = arith.constant 8 : index
    %c0_16 = arith.constant 0 : index
    %43 = vector.load %arg0[%c8, %c0_16] : memref<9x512xf32, #tpu.memory_space<vmem>>, vector<1x512xf32>
    %44 = vector.broadcast %43 : vector<1x512xf32> to vector<8x512xf32>
    %45 = arith.mulf %42, %44 : vector<8x512xf32>
    %46 = tpu.concatenate %13, %17, %21, %25, %29, %33, %37, %41, %45 in 0 : vector<8x512xf32>, vector<8x512xf32>, vector<8x512xf32>, vector<8x512xf32>, vector<8x512xf32>, vector<8x512xf32>, vector<8x512xf32>, vector<8x512xf32>, vector<8x512xf32> -> vector<72x512xf32>
    %c0_17 = arith.constant 0 : index
    %c0_18 = arith.constant 0 : index
    %47 = vector.load %arg4[%c0_17, %c0_18] : memref<16x72xf32, #tpu.memory_space<vmem>>, vector<16x72xf32>
    %cst_19 = arith.constant dense<0.000000e+00> : vector<16x512xf32>
    %48 = tpu.matmul %47, %46, %cst_19 {dimension_numbers = #tpu.dot_dimension_numbers<[1], [0], [0], [1], [0, 0, 1, 1], [], []>} : vector<16x72xf32>, vector<72x512xf32>, vector<16x512xf32> -> vector<16x512xf32>
    %c0_20 = arith.constant 0 : index
    %c0_21 = arith.constant 0 : index
    %49 = vector.load %arg5[%c0_20, %c0_21] : memref<16x1xf32, #tpu.memory_space<vmem>>, vector<16x1xf32>
    %50 = vector.broadcast %49 : vector<16x1xf32> to vector<16x512xf32>
    %51 = arith.addf %48, %50 : vector<16x512xf32>
    %cst_22 = arith.constant 0.000000e+00 : f32
    %52 = vector.broadcast %cst_22 : f32 to vector<16x512xf32>
    %53 = arith.maximumf %51, %52 : vector<16x512xf32>
    %c0_23 = arith.constant 0 : index
    %c0_24 = arith.constant 0 : index
    %54 = vector.load %arg6[%c0_23, %c0_24] : memref<8x16xf32, #tpu.memory_space<vmem>>, vector<8x16xf32>
    %cst_25 = arith.constant dense<0.000000e+00> : vector<8x512xf32>
    %55 = tpu.matmul %54, %53, %cst_25 {dimension_numbers = #tpu.dot_dimension_numbers<[1], [0], [0], [1], [0, 0, 1, 1], [], []>} : vector<8x16xf32>, vector<16x512xf32>, vector<8x512xf32> -> vector<8x512xf32>
    %c0_26 = arith.constant 0 : index
    %c0_27 = arith.constant 0 : index
    %56 = vector.load %arg7[%c0_26, %c0_27] : memref<8x1xf32, #tpu.memory_space<vmem>>, vector<8x1xf32>
    %57 = vector.broadcast %56 : vector<8x1xf32> to vector<8x512xf32>
    %58 = arith.addf %55, %57 : vector<8x512xf32>
    %cst_28 = arith.constant 0.000000e+00 : f32
    %59 = vector.broadcast %cst_28 : f32 to vector<8x512xf32>
    %60 = arith.maximumf %58, %59 : vector<8x512xf32>
    %cst_29 = arith.constant 0.000000e+00 : f32
    %61 = vector.broadcast %cst_29 : f32 to vector<8x128xf32>
    %62 = tpu.concatenate %61, %60, %61 in 1 : vector<8x128xf32>, vector<8x512xf32>, vector<8x128xf32> -> vector<8x768xf32>
    %63 = vector.extract_strided_slice %62 {offsets = [0, 111], sizes = [8, 512], strides = [1, 1]} : vector<8x768xf32> to vector<8x512xf32>
    %c0_30 = arith.constant 0 : index
    %c0_31 = arith.constant 0 : index
    %64 = vector.load %arg0[%c0_30, %c0_31] : memref<9x512xf32, #tpu.memory_space<vmem>>, vector<1x512xf32>
    %65 = vector.broadcast %64 : vector<1x512xf32> to vector<8x512xf32>
    %66 = arith.mulf %63, %65 : vector<8x512xf32>
    %67 = vector.extract_strided_slice %62 {offsets = [0, 112], sizes = [8, 512], strides = [1, 1]} : vector<8x768xf32> to vector<8x512xf32>
    %c1_32 = arith.constant 1 : index
    %c0_33 = arith.constant 0 : index
    %68 = vector.load %arg0[%c1_32, %c0_33] : memref<9x512xf32, #tpu.memory_space<vmem>>, vector<1x512xf32>
    %69 = vector.broadcast %68 : vector<1x512xf32> to vector<8x512xf32>
    %70 = arith.mulf %67, %69 : vector<8x512xf32>
    %71 = vector.extract_strided_slice %62 {offsets = [0, 113], sizes = [8, 512], strides = [1, 1]} : vector<8x768xf32> to vector<8x512xf32>
    %c2_34 = arith.constant 2 : index
    %c0_35 = arith.constant 0 : index
    %72 = vector.load %arg0[%c2_34, %c0_35] : memref<9x512xf32, #tpu.memory_space<vmem>>, vector<1x512xf32>
    %73 = vector.broadcast %72 : vector<1x512xf32> to vector<8x512xf32>
    %74 = arith.mulf %71, %73 : vector<8x512xf32>
    %75 = vector.extract_strided_slice %62 {offsets = [0, 127], sizes = [8, 512], strides = [1, 1]} : vector<8x768xf32> to vector<8x512xf32>
    %c3_36 = arith.constant 3 : index
    %c0_37 = arith.constant 0 : index
    %76 = vector.load %arg0[%c3_36, %c0_37] : memref<9x512xf32, #tpu.memory_space<vmem>>, vector<1x512xf32>
    %77 = vector.broadcast %76 : vector<1x512xf32> to vector<8x512xf32>
    %78 = arith.mulf %75, %77 : vector<8x512xf32>
    %79 = vector.extract_strided_slice %62 {offsets = [0, 128], sizes = [8, 512], strides = [1, 1]} : vector<8x768xf32> to vector<8x512xf32>
    %c4_38 = arith.constant 4 : index
    %c0_39 = arith.constant 0 : index
    %80 = vector.load %arg0[%c4_38, %c0_39] : memref<9x512xf32, #tpu.memory_space<vmem>>, vector<1x512xf32>
    %81 = vector.broadcast %80 : vector<1x512xf32> to vector<8x512xf32>
    %82 = arith.mulf %79, %81 : vector<8x512xf32>
    %83 = vector.extract_strided_slice %62 {offsets = [0, 129], sizes = [8, 512], strides = [1, 1]} : vector<8x768xf32> to vector<8x512xf32>
    %c5_40 = arith.constant 5 : index
    %c0_41 = arith.constant 0 : index
    %84 = vector.load %arg0[%c5_40, %c0_41] : memref<9x512xf32, #tpu.memory_space<vmem>>, vector<1x512xf32>
    %85 = vector.broadcast %84 : vector<1x512xf32> to vector<8x512xf32>
    %86 = arith.mulf %83, %85 : vector<8x512xf32>
    %87 = vector.extract_strided_slice %62 {offsets = [0, 143], sizes = [8, 512], strides = [1, 1]} : vector<8x768xf32> to vector<8x512xf32>
    %c6_42 = arith.constant 6 : index
    %c0_43 = arith.constant 0 : index
    %88 = vector.load %arg0[%c6_42, %c0_43] : memref<9x512xf32, #tpu.memory_space<vmem>>, vector<1x512xf32>
    %89 = vector.broadcast %88 : vector<1x512xf32> to vector<8x512xf32>
    %90 = arith.mulf %87, %89 : vector<8x512xf32>
    %91 = vector.extract_strided_slice %62 {offsets = [0, 144], sizes = [8, 512], strides = [1, 1]} : vector<8x768xf32> to vector<8x512xf32>
    %c7_44 = arith.constant 7 : index
    %c0_45 = arith.constant 0 : index
    %92 = vector.load %arg0[%c7_44, %c0_45] : memref<9x512xf32, #tpu.memory_space<vmem>>, vector<1x512xf32>
    %93 = vector.broadcast %92 : vector<1x512xf32> to vector<8x512xf32>
    %94 = arith.mulf %91, %93 : vector<8x512xf32>
    %95 = vector.extract_strided_slice %62 {offsets = [0, 145], sizes = [8, 512], strides = [1, 1]} : vector<8x768xf32> to vector<8x512xf32>
    %c8_46 = arith.constant 8 : index
    %c0_47 = arith.constant 0 : index
    %96 = vector.load %arg0[%c8_46, %c0_47] : memref<9x512xf32, #tpu.memory_space<vmem>>, vector<1x512xf32>
    %97 = vector.broadcast %96 : vector<1x512xf32> to vector<8x512xf32>
    %98 = arith.mulf %95, %97 : vector<8x512xf32>
    %99 = tpu.concatenate %66, %70, %74, %78, %82, %86, %90, %94, %98 in 0 : vector<8x512xf32>, vector<8x512xf32>, vector<8x512xf32>, vector<8x512xf32>, vector<8x512xf32>, vector<8x512xf32>, vector<8x512xf32>, vector<8x512xf32>, vector<8x512xf32> -> vector<72x512xf32>
    %c0_48 = arith.constant 0 : index
    %c0_49 = arith.constant 0 : index
    %100 = vector.load %arg8[%c0_48, %c0_49] : memref<16x72xf32, #tpu.memory_space<vmem>>, vector<16x72xf32>
    %cst_50 = arith.constant dense<0.000000e+00> : vector<16x512xf32>
    %101 = tpu.matmul %100, %99, %cst_50 {dimension_numbers = #tpu.dot_dimension_numbers<[1], [0], [0], [1], [0, 0, 1, 1], [], []>} : vector<16x72xf32>, vector<72x512xf32>, vector<16x512xf32> -> vector<16x512xf32>
    %c0_51 = arith.constant 0 : index
    %c0_52 = arith.constant 0 : index
    %102 = vector.load %arg9[%c0_51, %c0_52] : memref<16x1xf32, #tpu.memory_space<vmem>>, vector<16x1xf32>
    %103 = vector.broadcast %102 : vector<16x1xf32> to vector<16x512xf32>
    %104 = arith.addf %101, %103 : vector<16x512xf32>
    %cst_53 = arith.constant 0.000000e+00 : f32
    %105 = vector.broadcast %cst_53 : f32 to vector<16x512xf32>
    %106 = arith.maximumf %104, %105 : vector<16x512xf32>
    %107 = arith.addf %106, %53 : vector<16x512xf32>
    %c0_54 = arith.constant 0 : index
    %c0_55 = arith.constant 0 : index
    %108 = vector.load %arg10[%c0_54, %c0_55] : memref<16x512xf32, #tpu.memory_space<vmem>>, vector<16x512xf32>
    tpu.vector_store %arg10[%c0_54, %c0_55], %107 {strides = array<i32>} : memref<16x512xf32, #tpu.memory_space<vmem>>, vector<16x512xf32>,
    return
  }
}

</mosaic_0001>

<bundles_post_ra>
// kernel: tpu_custom_call.1
= control target key start
LH: loop header
LB: loop body
LE: loop exit
PB: predicated region body
PF: predicated region fallthrough
CT: control target
= control target key end

     0   :  { %15 = vsyncpa [#allocation3], 0  ;;  %s2932_s0 = inlined_call_operand.hbm [shape: f32[9,512], index: 0, kind: input, shape index: {}]   ;;  %s2933_s1 = inlined_call_operand.vmem [shape: f32[4,512], index: 1, kind: input, shape index: {}]   ;;  %s2934_s2 = inlined_call_operand.vmem [shape: f32[8,4], index: 2, kind: input, shape index: {}]   ;;  %s2935_s3 = inlined_call_operand.vmem [shape: f32[8,1], index: 3, kind: input, shape index: {}]   ;;  %s2936_s4 = inlined_call_operand.vmem [shape: f32[16,72], index: 4, kind: input, shape index: {}]   ;;  %s2937_s5 = inlined_call_operand.vmem [shape: f32[16,1], index: 5, kind: input, shape index: {}]   ;;  %s2938_s6 = inlined_call_operand.vmem [shape: f32[8,16], index: 6, kind: input, shape index: {}]   ;;  %s2939_s7 = inlined_call_operand.vmem [shape: f32[8,1], index: 7, kind: input, shape index: {}]   ;;  %s2940_s8 = inlined_call_operand.vmem [shape: f32[16,72], index: 8, kind: input, shape index: {}]   ;;  %s2941_s9 = inlined_call_operand.vmem [shape: f32[16,1], index: 9, kind: input, shape index: {}]   ;;  %s2942_s10 = inlined_call_operand.hbm [shape: f32[16,512], index: 10, kind: output, shape index: {}]  }
   0x1   :  { %16 = vsyncpa [#allocation4], 0  ;;  %s1860_s13 = smov [#allocation2]  }
   0x2   :  { %s22_s14 = sshll.u32 %s1860_s13, 4  ;;  %s23_s14 = int_to_ptr.vmem [resolvable:$true] %s22_s14 }
   0x3   :  { %s1824_s15 = scalar_lea.vmem %s23_s14, 1024  ;;  %p1829_p1 = scmp.lt.s32.totalorder %s23_s14, %s23_s14 }
   0x4   :  { %p1825_p0 = scmp.ne.s32.totalorder %s23_s14, %s1824_s15  ;;  %p1830_p2 = scmp.lt.s32.totalorder %s1824_s15, %s1824_s15 }
   0x6   :  { %p1831_p3 = por %p1830_p2, %p1829_p1 }
   0x8   :  { %p1832_p4 = pnand %p1831_p3, %p1825_p0 }
   0xa   :  { %1835 = shalt.err (!%p1832_p4)
}
   0xb   :  { %s1861_s16 = smov 512   ;;  %s1862_s17 = smov 32  }
   0xc   :  { %28 = dma.hbm_to_vmem [thread:$0]  %s2932_s0, 1024, %s23_s14, [#allocation3], %s1861_s16, %s1861_s16, %s1862_s17  }
   0xd   :  { %1856 = dma.done.wait [#allocation3], 1024  }
   0xe   :  { %1857 = vsyncadd [#allocation3], 4294966272  ;;  %v2943_v0 = vmov 0.0   ;;  %v224_v1 = vlaneseq  ;;  %v1864_v2 = vmov 0   ;;  %v50_v6 = vld [vmem:[%s2933_s1] sm:$0xff]  ;;  %vm67_vm0 = vcmask 1043456  }
   0xf   :  { %140 = vmatprep.mubr.f32.mxu0 %v2943_v0  ;;  %211 = vmatprep.mubr.f32.mxu1 %v2943_v0  ;;  %v51_v7 = vld [vmem:[%s2933_s1 + $0x8] sm:$0xff]  ;;  %v61_v8 = vcombine.high %v50_v6, %v50_v6  ;;  %vm63_vm1 = vcmask 31744   ;;  %v53_v10 = vld [vmem:[%s2935_s3] sm:$0xff]  ;;  %s1865_s1 = smov 17   ;;  %s1867_s3 = smov 15   ;;  %vm562_vm2 = vcmask 138240  }
  0x10   :  { %1812 = vset.pattern.permute.xlu0 %v1864_v2  ;;  %1813 = vset.pattern.permute.xlu1 %v1864_v2  ;;  %v225_v3 = vshrl.u32 %v224_v1, 7  ;;  %v62_v9 = vcombine.high %v51_v7, %v51_v7  ;;  %v536_v11 = vld [vmem:[#allocation2 + $0x20] ss:$8 sm:$0xf]  ;;  %s1868_s27 = smov 1   ;;  %s1869_s28 = smov 127  }
  0x11   :  { %v52_v12 = vld [vmem:[%s2934_s2] sm:$0xff]  ;;  %56 = vperm.xlu0 %1812, %v53_v10   ;;  %1777 = vmatprep.subr.msk.mxu0 %vm67_vm0, %v61_v8  ;;  %s1866_s2 = smov 16   ;;  %s1870_s29 = smov 113   ;;  %vm521_vm3 = vcmask 130048   ;;  %vm480_vm4 = vcmask 121856   ;;  %vm439_vm5 = vcmask 7168  }
  0x12   :  { %v1942_v4 = vsub.s32 1, %v225_v3  ;;  %v1944_v5 = vsub.s32 0, %v225_v3  ;;  %v1960_v15 = vsub.s32 2, %v225_v3  ;;  %v1962_v16 = vsub.s32 3, %v225_v3  ;;  %1780 = vmatprep.subr.msk.mxu1 %vm67_vm0, %v62_v9  ;;  %1778 = vmatpush1.msk.msra.mxu0 %vm67_vm0, %v50_v6  ;;  %s1871_s30 = smov 112   ;;  %s1872_s11 = smov 111  }
  0x13   :  { %1781 = vmatpush1.msk.msra.mxu1 %vm67_vm0, %v51_v7  ;;  %1779 = vmatmul.mubr.msk.f32.vlgmr.msra.gmra.mxu0 %vm63_vm1, %v52_v12  ;;  %v495_v19 = vld [vmem:[#allocation2 + $0x7] ss:$8 sm:$0xf]  ;;  %v454_v24 = vld [vmem:[#allocation2 + $0x6] ss:$8 sm:$0xf] }
  0x14   :  { %v545_v13 = vrot.slane %v536_v11, %v1942_v4  ;;  %v541_v14 = vrot.slane %v536_v11, %v1944_v5  ;;  %1782 = vmatmul.mubr.msk.f32.vlgmr.msra.gmra.mxu1 %vm63_vm1, %v52_v12  ;;  %v549_v17 = vrot.slane %v536_v11, %v1960_v15  ;;  %v553_v18 = vrot.slane %v536_v11, %v1962_v16  ;;  %v413_v29 = vld [vmem:[#allocation2 + $0x5] ss:$8 sm:$0xf]  ;;  %v345_v34 = vld [vmem:[#allocation2 + $0x3] ss:$8 sm:$0xf] }
  0x15   :  { %1058 = vmatprep.mubr.f32.mxu1 %v2943_v0  ;;  %981 = vmatprep.mubr.f32.mxu0 %v2943_v0  ;;  %v500_v20 = vrot.slane %v495_v19, %v1944_v5  ;;  %v504_v21 = vrot.slane %v495_v19, %v1942_v4  ;;  %v508_v22 = vrot.slane %v495_v19, %v1960_v15  ;;  %v304_v39 = vld [vmem:[#allocation2 + $0x2] ss:$8 sm:$0xf]  ;;  %v263_v44 = vld [vmem:[#allocation2 + $0x1] ss:$8 sm:$0xf] }
  0x16   :  { %556 = vrot.lane.b32.xlu1 %v545_v13, %s1865_s1  ;;  %554 = vrot.lane.b32.xlu0 %v541_v14, %s1865_s1  ;;  %v512_v23 = vrot.slane %v495_v19, %v1962_v16  ;;  %v459_v25 = vrot.slane %v454_v24, %v1944_v5  ;;  %v463_v26 = vrot.slane %v454_v24, %v1942_v4  ;;  %v222_v49 = vld [vmem:[#allocation2] ss:$8 sm:$0xf]  ;;  %s1873_s12 = smov 94   ;;  %s1874_s13 = smov 95   ;;  %vm330_vm6 = vcmask 924672  }
  0x17   :  { %v467_v27 = vrot.slane %v454_v24, %v1960_v15  ;;  %v471_v28 = vrot.slane %v454_v24, %v1962_v16  ;;  %v418_v30 = vrot.slane %v413_v29, %v1944_v5  ;;  %v422_v31 = vrot.slane %v413_v29, %v1942_v4  ;;  %s1875_s14 = smov 96   ;;  %s1876_s15 = smov 110  }
  0x18   :  { %v426_v32 = vrot.slane %v413_v29, %v1960_v15  ;;  %v430_v33 = vrot.slane %v413_v29, %v1962_v16  ;;  %v350_v35 = vrot.slane %v345_v34, %v1944_v5  ;;  %v354_v36 = vrot.slane %v345_v34, %v1942_v4  ;;  %s1877_s18 = smov 126  }
  0x19   :  { %v358_v37 = vrot.slane %v345_v34, %v1960_v15  ;;  %v362_v38 = vrot.slane %v345_v34, %v1962_v16  ;;  %v309_v40 = vrot.slane %v304_v39, %v1944_v5  ;;  %v313_v41 = vrot.slane %v304_v39, %v1942_v4 }
  0x1a   :  { %558 = vrot.lane.b32.xlu1 %v549_v17, %s1865_s1  ;;  %560 = vrot.lane.b32.xlu0 %v553_v18, %s1865_s1  ;;  %v317_v42 = vrot.slane %v304_v39, %v1960_v15  ;;  %v321_v43 = vrot.slane %v304_v39, %v1962_v16  ;;  %v268_v45 = vrot.slane %v263_v44, %v1944_v5  ;;  %vm248_vm7 = vcmask 908288  }
  0x1b   :  { %v272_v46 = vrot.slane %v263_v44, %v1942_v4  ;;  %v276_v47 = vrot.slane %v263_v44, %v1960_v15  ;;  %v280_v48 = vrot.slane %v263_v44, %v1962_v16  ;;  %v227_v50 = vrot.slane %v222_v49, %v1944_v5 }
  0x1c   :  { %v231_v51 = vrot.slane %v222_v49, %v1942_v4  ;;  %v235_v52 = vrot.slane %v222_v49, %v1960_v15  ;;  %v239_v53 = vrot.slane %v222_v49, %v1962_v16  ;;  %vm371_vm8 = vcmask 1039360  }
  0x1d   :  { %vm289_vm9 = vcmask 916480   ;;  %vm610_vm10 = vcmask 1031168   ;;  %vm724_vm11 = vcmask 769024   ;;  %vm704_vm12 = vcmask 777216  }
  0x1e   :  { %513 = vrot.lane.b32.xlu1 %v500_v20, %s1866_s2  ;;  %515 = vrot.lane.b32.xlu0 %v504_v21, %s1866_s2  ;;  %vm684_vm13 = vcmask 785408   ;;  %vm664_vm14 = vcmask 900096   ;;  %vm910_vm15 = vcmask 588800  }
  0x22   :  { %517 = vrot.lane.b32.xlu1 %v508_v22, %s1866_s2  ;;  %519 = vrot.lane.b32.xlu0 %v512_v23, %s1866_s2 }
  0x26   :  { %472 = vrot.lane.b32.xlu1 %v459_v25, %s1867_s3  ;;  %474 = vrot.lane.b32.xlu0 %v463_v26, %s1867_s3 }
  0x2a   :  { %476 = vrot.lane.b32.xlu1 %v467_v27, %s1867_s3  ;;  %478 = vrot.lane.b32.xlu0 %v471_v28, %s1867_s3 }
  0x2e   :  { %431 = vrot.lane.b32.xlu1 %v418_v30, %s1868_s27  ;;  %433 = vrot.lane.b32.xlu0 %v422_v31, %s1868_s27 }
  0x32   :  { %435 = vrot.lane.b32.xlu1 %v426_v32, %s1868_s27  ;;  %437 = vrot.lane.b32.xlu0 %v430_v33, %s1868_s27 }
  0x36   :  { %363 = vrot.lane.b32.xlu1 %v350_v35, %s1869_s28  ;;  %365 = vrot.lane.b32.xlu0 %v354_v36, %s1869_s28 }
  0x3a   :  { %367 = vrot.lane.b32.xlu1 %v358_v37, %s1869_s28  ;;  %369 = vrot.lane.b32.xlu0 %v362_v38, %s1869_s28 }
  0x3e   :  { %322 = vrot.lane.b32.xlu1 %v309_v40, %s1870_s29  ;;  %324 = vrot.lane.b32.xlu0 %v313_v41, %s1870_s29 }
  0x42   :  { %326 = vrot.lane.b32.xlu1 %v317_v42, %s1870_s29  ;;  %328 = vrot.lane.b32.xlu0 %v321_v43, %s1870_s29  ;;  %v2113_v43 = vld [vmem:[#allocation2 + $0x4] ss:$8 sm:$0xf] }
  0x46   :  { %281 = vrot.lane.b32.xlu1 %v268_v45, %s1871_s30  ;;  %283 = vrot.lane.b32.xlu0 %v272_v46, %s1871_s30 }
  0x4a   :  { %285 = vrot.lane.b32.xlu1 %v276_v47, %s1871_s30  ;;  %287 = vrot.lane.b32.xlu0 %v280_v48, %s1871_s30 }
  0x4e   :  { %240 = vrot.lane.b32.xlu1 %v227_v50, %s1872_s11  ;;  %242 = vrot.lane.b32.xlu0 %v231_v51, %s1872_s11  ;;  %v2137_v50 = vrot.slane %v2113_v43, %v1944_v5  ;;  %v2155_v5 = vrot.slane %v2113_v43, %v1960_v15 }
  0x50   :  { %2970 = vst [vmem:[#allocation12_spill] sm:$0xff] %v2155_v5 }
  0x52   :  { %244 = vrot.lane.b32.xlu1 %v235_v52, %s1872_s11  ;;  %246 = vrot.lane.b32.xlu0 %v239_v53, %s1872_s11 }
  0x88   :  { %v2016_v54 = vpop.permute.xlu1 %556 }
  0x8c   :  { %v2018_v55 = vpop.permute.xlu1 %558  ;;  %v2020_v56 = vpop.permute.xlu0 %56 }
  0x8d   :  { %v2094_v36 = vsel %vm562_vm2, %v2016_v54, %v2018_v55 }
  0x90   :  { %v2022_v57 = vpop.permute.xlu1 %513  ;;  %v2024_v58 = vpop.permute.xlu0 %554 }
  0x94   :  { %v2026_v59 = vpop.permute.xlu1 %517  ;;  %v2028_v60 = vpop.permute.xlu0 %560 }
  0x95   :  { %v575_v61 = vmul.f32 0.0, %v2028_v60 }
  0x97   :  { %722 = vrot.lane.b32.xlu1 %v575_v61, %s1873_s12 }
  0x98   :  { %v2031_v62 = vpop.permute.xlu1 %472  ;;  %v2034_v63 = vpop.permute.xlu0 %515 }
  0x99   :  { %v2099_v37 = vsel %vm521_vm3, %v2034_v63, %v2026_v59 }
  0x9c   :  { %v2036_v1 = vpop.permute.xlu1 %476  ;;  %v2038_v2 = vpop.permute.xlu0 %519 }
  0x9d   :  { %v534_v3 = vmul.f32 0.0, %v2038_v2 }
  0x9f   :  { %702 = vrot.lane.b32.xlu0 %v534_v3, %s1874_s13 }
  0xa0   :  { %v2041_v6 = vpop.permute.xlu1 %431  ;;  %v2044_v7 = vpop.permute.xlu0 %474 }
  0xa1   :  { %v2124_v46 = vsel %vm480_vm4, %v2044_v7, %v2036_v1 }
  0xa4   :  { %v2046_v8 = vpop.permute.xlu1 %435  ;;  %v2048_v9 = vpop.permute.xlu0 %478 }
  0xa5   :  { %v493_v10 = vmul.f32 0.0, %v2048_v9 }
  0xa7   :  { %682 = vrot.lane.b32.xlu1 %v493_v10, %s1875_s14 }
  0xa8   :  { %v2051_v11 = vpop.permute.xlu1 %363  ;;  %v2054_v12 = vpop.permute.xlu0 %433 }
  0xa9   :  { %v380_v13 = vmul.f32 0.0, %v2051_v11  ;;  %v2129_v47 = vsel %vm439_vm5, %v2054_v12, %v2046_v8 }
  0xab   :  { %620 = vrot.lane.b32.xlu1 %v380_v13, %s1871_s30 }
  0xac   :  { %v2057_v14 = vpop.permute.xlu1 %367  ;;  %v2060_v17 = vpop.permute.xlu0 %437 }
  0xad   :  { %v452_v18 = vmul.f32 0.0, %v2060_v17 }
  0xaf   :  { %662 = vrot.lane.b32.xlu0 %v452_v18, %s1876_s15 }
  0xb0   :  { %v323_v19 = vpop.permute.xlu1 %322  ;;  %v2071_v24 = vpop.permute.xlu0 %365 }
  0xb1   :  { %v339_v20 = vmul.f32 0.0, %v323_v19 }
  0xb3   :  { %600 = vrot.lane.b32.xlu0 %v339_v20, %s1877_s18 }
  0xb4   :  { %v2064_v21 = vpop.permute.xlu1 %326  ;;  %v2073_v25 = vpop.permute.xlu0 %369 }
  0xb5   :  { %2966 = vst [vmem:[#allocation8_spill] sm:$0xff] %v2073_v25 }
  0xb8   :  { %v2067_v22 = vpop.permute.xlu1 %281  ;;  %v2075_v26 = vpop.permute.xlu0 %324 }
  0xb9   :  { %v298_v23 = vmul.f32 0.0, %v2067_v22  ;;  %v2143_v51 = vsel %vm330_vm6, %v323_v19, %v2075_v26 }
  0xba   :  { %2969 = vst [vmem:[#allocation11_spill] sm:$0xff] %v2143_v51 }
  0xbb   :  { %581 = vrot.lane.b32.xlu1 %v298_v23, %s1869_s28 }
  0xbc   :  { %v2079_v31 = vpop.permute.xlu0 %328  ;;  %v2115_v44 = vpop.permute.xlu1 %285 }
  0xbd   :  { %2967 = vst [vmem:[#allocation9_spill] sm:$0xff] %v2079_v31  ;;  %v2160_v10 = vsel %vm330_vm6, %v2064_v21, %v2079_v31 }
  0xbe   :  { %2971 = vst [vmem:[#allocation13_spill] sm:$0xff] %v2160_v10 }
  0xc0   :  { %v2101_v38 = vpop.permute.xlu0 %283  ;;  %v2145_v52 = vpop.permute.xlu1 %240 }
  0xc4   :  { %v2117_v45 = vpop.permute.xlu0 %287  ;;  %v2173_v20 = vpop.permute.xlu1 %244 }
  0xc5   :  { %2968 = vst [vmem:[#allocation10_spill] sm:$0xff] %v2117_v45 }
  0xc8   :  { %v2147_v53 = vpop.permute.xlu0 %242 }
  0xc9   :  { %v2171_v15 = vsel %vm248_vm7, %v2145_v52, %v2147_v53 }
  0xca   :  { %2972 = vst [vmem:[#allocation14_spill] sm:$0xff] %v2171_v15 }
  0xcc   :  { %v2175_v23 = vpop.permute.xlu0 %246 }
  0xd3   :  { %v142_v27 = vpop.f32.mrf.mxu0 }
  0xd4   :  { %v213_v28 = vpop.f32.mrf.mxu1  ;;  %v143_v29 = vadd.f32 %v142_v27, %v2020_v56  ;;  %v2182_v27 = vsel %vm371_vm8, %v2051_v11, %v2071_v24  ;;  %v2199_v11 = vsel %vm371_vm8, %v2057_v14, %v2073_v25 }
  0xd5   :  { %v214_v30 = vadd.f32 %v213_v28, %v2020_v56  ;;  %v144_v19 = vpop.f32.mrf.mxu0  ;;  %2973 = vst [vmem:[#allocation15_spill] sm:$0xff] %v2182_v27  ;;  %2975 = vst [vmem:[#allocation17_spill] sm:$0xff] %v2199_v11 }
  0xd6   :  { %v2081_v32 = vmax.f32 %v143_v29, 0.0  ;;  %v145_v28 = vadd.f32 %v144_v19, %v2020_v56  ;;  %v2258_v19 = vsel %vm521_vm3, %v2026_v59, %v2038_v2  ;;  %v2278_v59 = vsel %vm439_vm5, %v2041_v6, %v2054_v12 }
  0xd7   :  { %v2083_v33 = vmax.f32 %v214_v30, 0.0 }
  0xd8   :  { %v571_v34 = vmul.f32 %v2024_v58, %v2081_v32  ;;  %v530_v35 = vmul.f32 %v2022_v57, %v2081_v32  ;;  %v489_v41 = vmul.f32 %v2031_v62, %v2081_v32  ;;  %v448_v42 = vmul.f32 %v2041_v6, %v2081_v32 }
  0xd9   :  { %v573_v39 = vmul.f32 %v2094_v36, %v2083_v33  ;;  %v532_v40 = vmul.f32 %v2099_v37, %v2083_v33  ;;  %v491_v48 = vmul.f32 %v2124_v46, %v2083_v33  ;;  %v450_v49 = vmul.f32 %v2129_v47, %v2083_v33 }
  0xda   :  { %714 = vrot.lane.b32.xlu1 %v571_v34, %s1873_s12  ;;  %694 = vrot.lane.b32.xlu0 %v530_v35, %s1874_s13  ;;  %v408_v61 = vmul.f32 %v2137_v50, %v2081_v32  ;;  %v340_v3 = vmul.f32 %v2143_v51, %v2081_v32  ;;  %v410_v13 = vmul.f32 %v2155_v5, %v2083_v33  ;;  %v215_v34 = vpop.f32.mrf.mxu1 }
  0xdb   :  { %v342_v18 = vmul.f32 %v2160_v10, %v2083_v33  ;;  %v381_v29 = vmul.f32 %v2182_v27, %v2081_v32  ;;  %v258_v30 = vmul.f32 %v2171_v15, %v2081_v32  ;;  %v2192_v35 = vsel %vm248_vm7, %v2173_v20, %v2175_v23 }
  0xdc   :  { %2974 = vst [vmem:[#allocation16_spill] sm:$0xff] %v2192_v35 }
  0xde   :  { %718 = vrot.lane.b32.xlu1 %v573_v39, %s1873_s12  ;;  %698 = vrot.lane.b32.xlu0 %v532_v40, %s1874_s13  ;;  %v219_v39 = vmax.f32 %v145_v28, 0.0  ;;  %v216_v40 = vadd.f32 %v215_v34, %v2020_v56  ;;  %v2320_v34 = vsel %vm289_vm9, %v2101_v38, %v2115_v44 }
  0xdf   :  { %2981 = vst [vmem:[#allocation23_spill] sm:$0xff] %v2320_v34 }
  0xe0   :  { %v2218_v56 = vmax.f32 %v216_v40, 0.0  ;;  %v300_v40 = vmul.f32 %v2320_v34, %v219_v39 }
  0xe2   :  { %674 = vrot.lane.b32.xlu1 %v489_v41, %s1875_s14  ;;  %654 = vrot.lane.b32.xlu0 %v448_v42, %s1876_s15  ;;  %v383_v41 = vmul.f32 %v2199_v11, %v2083_v33  ;;  %v260_v42 = vmul.f32 %v2192_v35, %v2083_v33 }
  0xe6   :  { %678 = vrot.lane.b32.xlu1 %v491_v48, %s1875_s14  ;;  %658 = vrot.lane.b32.xlu0 %v450_v49, %s1876_s15  ;;  %v2209_v48 = vsel %vm289_vm9, %v2067_v22, %v2101_v38  ;;  %v2216_v49 = vsel %vm562_vm2, %v2024_v58, %v2016_v54  ;;  %v2226_v22 = vsel %vm289_vm9, %v2115_v44, %v2117_v45 }
  0xe7   :  { %2976 = vst [vmem:[#allocation18_spill] sm:$0xff] %v2209_v48  ;;  %2977 = vst [vmem:[#allocation19_spill] sm:$0xff] %v2226_v22  ;;  %v2233_v54 = vsel %vm562_vm2, %v2018_v55, %v2028_v60  ;;  %v2249_v55 = vsel %vm480_vm4, %v2031_v62, %v2044_v7  ;;  %v533_v7 = vmul.f32 %v2258_v19, %v2218_v56 }
  0xe8   :  { %v302_v38 = vmul.f32 %v2117_v45, %v2218_v56 }
  0xea   :  { %638 = vrot.lane.b32.xlu1 %v408_v61, %s1872_s11  ;;  %602 = vrot.lane.b32.xlu0 %v340_v3, %s1877_s18  ;;  %v299_v61 = vmul.f32 %v2209_v48, %v2081_v32  ;;  %v572_v3 = vmul.f32 %v2216_v49, %v219_v39  ;;  %v574_v32 = vmul.f32 %v2233_v54, %v2218_v56 }
  0xee   :  { %642 = vrot.lane.b32.xlu1 %v410_v13, %s1872_s11  ;;  %606 = vrot.lane.b32.xlu0 %v342_v18, %s1877_s18  ;;  %v301_v13 = vmul.f32 %v2226_v22, %v2083_v33  ;;  %v2244_v18 = vsel %vm521_vm3, %v2022_v57, %v2034_v63  ;;  %v490_v33 = vmul.f32 %v2249_v55, %v219_v39 }
  0xef   :  { %v531_v60 = vmul.f32 %v2244_v18, %v219_v39  ;;  %v2263_v63 = vsel %vm480_vm4, %v2036_v1, %v2048_v9  ;;  %v449_v1 = vmul.f32 %v2278_v59, %v219_v39  ;;  %v2284_v9 = vrot.slane %v2113_v43, %v1962_v16 }
  0xf0   :  { %v492_v28 = vmul.f32 %v2263_v63, %v2218_v56  ;;  %v2300_v16 = vsel %vm330_vm6, %v2075_v26, %v2064_v21  ;;  %v343_v21 = vmul.f32 %v2079_v31, %v2218_v56  ;;  %v384_v26 = vmul.f32 %v2073_v25, %v2218_v56 }
  0xf1   :  { %2978 = vst [vmem:[#allocation20_spill] sm:$0xff] %v2284_v9  ;;  %2979 = vst [vmem:[#allocation21_spill] sm:$0xff] %v2300_v16 }
  0xf2   :  { %622 = vrot.lane.b32.xlu1 %v381_v29, %s1871_s30  ;;  %750 = vrot.lane.b32.xlu0 %v258_v30, %s1865_s1  ;;  %v2271_v29 = vrot.slane %v2113_v43, %v1942_v4  ;;  %v2291_v4 = vsel %vm439_vm5, %v2046_v8, %v2060_v17  ;;  %v411_v30 = vmul.f32 %v2284_v9, %v2218_v56 }
  0xf3   :  { %v451_v12 = vmul.f32 %v2291_v4, %v2218_v56  ;;  %v2307_v8 = vsel %vm371_vm8, %v2071_v24, %v2057_v14  ;;  %v341_v17 = vmul.f32 %v2300_v16, %v219_v39  ;;  %v2325_v14 = vsel %vm248_vm7, %v2147_v53, %v2173_v20 }
  0xf4   :  { %v409_v2 = vmul.f32 %v2271_v29, %v219_v39  ;;  %2980 = vst [vmem:[#allocation22_spill] sm:$0xff] %v2307_v8  ;;  %v382_v43 = vmul.f32 %v2307_v8, %v219_v39  ;;  %2982 = vst [vmem:[#allocation24_spill] sm:$0xff] %v2325_v14  ;;  %v259_v24 = vmul.f32 %v2325_v14, %v219_v39 }
  0xf6   :  { %626 = vrot.lane.b32.xlu1 %v383_v41, %s1871_s30  ;;  %754 = vrot.lane.b32.xlu0 %v260_v42, %s1865_s1 }
  0xfa   :  { %583 = vrot.lane.b32.xlu1 %v299_v61, %s1869_s28  ;;  %716 = vrot.lane.b32.xlu0 %v572_v3, %s1873_s12 }
  0xfe   :  { %587 = vrot.lane.b32.xlu1 %v301_v13, %s1869_s28  ;;  %720 = vrot.lane.b32.xlu0 %v574_v32, %s1873_s12 }
 0x102   :  { %696 = vrot.lane.b32.xlu1 %v531_v60, %s1874_s13  ;;  %676 = vrot.lane.b32.xlu0 %v490_v33, %s1875_s14 }
 0x106   :  { %700 = vrot.lane.b32.xlu1 %v533_v7, %s1874_s13  ;;  %680 = vrot.lane.b32.xlu0 %v492_v28, %s1875_s14 }
 0x109   :  { %v2336_v44 = vpop.permute.xlu1 %722 }
 0x10a   :  { %656 = vrot.lane.b32.xlu1 %v449_v1, %s1876_s15  ;;  %640 = vrot.lane.b32.xlu0 %v409_v2, %s1872_s11 }
 0x10e   :  { %660 = vrot.lane.b32.xlu1 %v451_v12, %s1876_s15  ;;  %644 = vrot.lane.b32.xlu0 %v411_v30, %s1872_s11 }
 0x111   :  { %v2338_v53 = vpop.permute.xlu0 %702 }
 0x112   :  { %604 = vrot.lane.b32.xlu1 %v341_v17, %s1877_s18  ;;  %624 = vrot.lane.b32.xlu0 %v382_v43, %s1871_s30 }
 0x116   :  { %608 = vrot.lane.b32.xlu1 %v343_v21, %s1877_s18  ;;  %628 = vrot.lane.b32.xlu0 %v384_v26, %s1871_s30 }
 0x119   :  { %v2340_v20 = vpop.permute.xlu1 %682 }
 0x11a   :  { %752 = vrot.lane.b32.xlu1 %v259_v24, %s1865_s1  ;;  %585 = vrot.lane.b32.xlu0 %v300_v40, %s1869_s28 }
 0x11d   :  { %v2344_v42 = vpop.permute.xlu1 %620 }
 0x11e   :  { %589 = vrot.lane.b32.xlu0 %v302_v38, %s1869_s28  ;;  %2983 = vst [vmem:[#allocation25_spill] sm:$0xff] %v2344_v42 }
 0x121   :  { %v2342_v41 = vpop.permute.xlu0 %662 }
 0x125   :  { %v2348_v61 = vpop.permute.xlu0 %600 }
 0x126   :  { %2985 = vst [vmem:[#allocation27_spill] sm:$0xff] %v2348_v61 }
 0x12d   :  { %v2346_v39 = vpop.permute.xlu1 %581 }
 0x12e   :  { %2984 = vst [vmem:[#allocation26_spill] sm:$0xff] %v2346_v39 }
 0x14c   :  { %v715_v3 = vpop.permute.xlu1 %714  ;;  %v695_v13 = vpop.permute.xlu0 %694 }
 0x14d   :  { %818 = vrot.lane.b32.xlu1 %v695_v13, %s1865_s1  ;;  %828 = vrot.lane.b32.xlu0 %v715_v3, %s1865_s1 }
 0x150   :  { %v719_v32 = vpop.permute.xlu1 %718  ;;  %v699_v60 = vpop.permute.xlu0 %698 }
 0x154   :  { %v2352_v33 = vpop.permute.xlu1 %674  ;;  %v2354_v7 = vpop.permute.xlu0 %654 }
 0x155   :  { %798 = vrot.lane.b32.xlu1 %v2354_v7, %s1865_s1  ;;  %808 = vrot.lane.b32.xlu0 %v2352_v33, %s1865_s1 }
 0x158   :  { %v2360_v28 = vpop.permute.xlu1 %678  ;;  %v2362_v1 = vpop.permute.xlu0 %658 }
 0x15c   :  { %v2364_v2 = vpop.permute.xlu1 %638  ;;  %v2366_v12 = vpop.permute.xlu0 %602 }
 0x15d   :  { %788 = vrot.lane.b32.xlu0 %v2364_v2, %s1865_s1  ;;  %v611_v43 = vsel %vm610_vm10, %v2348_v61, %v2366_v12 }
 0x160   :  { %v2370_v30 = vpop.permute.xlu1 %642  ;;  %v2372_v17 = vpop.permute.xlu0 %606 }
 0x161   :  { %768 = vrot.lane.b32.xlu0 %v611_v43, %s1865_s1 }
 0x164   :  { %v2378_v21 = vpop.permute.xlu1 %622  ;;  %v2380_v26 = vpop.permute.xlu0 %750 }
 0x165   :  { %v630_v24 = vsel %vm289_vm9, %v2344_v42, %v2378_v21 }
 0x166   :  { %778 = vrot.lane.b32.xlu1 %v630_v24, %s1865_s1 }
 0x168   :  { %v2386_v40 = vpop.permute.xlu1 %626  ;;  %v2388_v38 = vpop.permute.xlu0 %754 }
 0x16c   :  { %v2390_v0 = vpop.permute.xlu1 %583  ;;  %v717_v35 = vpop.permute.xlu0 %716 }
 0x16d   :  { %v591_v43 = vsel %vm371_vm8, %v2346_v39, %v2390_v0  ;;  %v726_v25 = vsel %vm724_vm11, %v717_v35, %v719_v32  ;;  %v725_v9 = vsel %vm724_vm11, %v715_v3, %v717_v35 }
 0x16e   :  { %758 = vrot.lane.b32.xlu1 %v591_v43, %s1865_s1 }
 0x170   :  { %v2396_v61 = vpop.permute.xlu1 %587  ;;  %v721_v14 = vpop.permute.xlu0 %720 }
 0x171   :  { %v728_v8 = vsel %vm724_vm11, %v721_v14, %v2336_v44 }
 0x174   :  { %v697_v15 = vpop.permute.xlu1 %696  ;;  %v677_v42 = vpop.permute.xlu0 %676 }
 0x175   :  { %v705_v27 = vsel %vm704_vm12, %v695_v13, %v697_v15  ;;  %v706_v13 = vsel %vm704_vm12, %v697_v15, %v699_v60  ;;  %v685_v15 = vsel %vm684_vm13, %v2352_v33, %v677_v42 }
 0x178   :  { %v701_v45 = vpop.permute.xlu1 %700  ;;  %v681_v24 = vpop.permute.xlu0 %680 }
 0x179   :  { %v707_v5 = vsel %vm704_vm12, %v699_v60, %v701_v45  ;;  %v708_v35 = vsel %vm704_vm12, %v701_v45, %v2338_v53  ;;  %v687_v45 = vsel %vm684_vm13, %v2360_v28, %v681_v24 }
 0x17c   :  { %v657_v22 = vpop.permute.xlu1 %656  ;;  %v641_v34 = vpop.permute.xlu0 %640 }
 0x180   :  { %v661_v48 = vpop.permute.xlu1 %660  ;;  %v645_v31 = vpop.permute.xlu0 %644 }
 0x181   :  { %796 = vrot.lane.b32.xlu1 %v645_v31, %s1865_s1 }
 0x184   :  { %v2399_v10 = vpop.permute.xlu1 %604  ;;  %v625_v16 = vpop.permute.xlu0 %624 }
 0x185   :  { %v631_v3 = vsel %vm289_vm9, %v2378_v21, %v625_v16  ;;  %v613_v33 = vsel %vm610_vm10, %v2399_v10, %v2372_v17 }
 0x188   :  { %v2401_v51 = vpop.permute.xlu1 %608  ;;  %v629_v39 = vpop.permute.xlu0 %628 }
 0x189   :  { %776 = vrot.lane.b32.xlu1 %v2401_v51, %s1865_s1  ;;  %786 = vrot.lane.b32.xlu0 %v629_v39, %s1865_s1  ;;  %v633_v60 = vsel %vm289_vm9, %v2386_v40, %v629_v39 }
 0x18c   :  { %v2406_v43 = vpop.permute.xlu0 %585 }
 0x18d   :  { %832 = vrot.lane.b32.xlu1 %v726_v25, %s1865_s1  ;;  %v727_v25 = vsel %vm724_vm11, %v719_v32, %v721_v14  ;;  %v647_v14 = vsel %vm248_vm7, %v641_v34, %v2370_v30  ;;  %v668_v32 = vsel %vm664_vm14, %v661_v48, %v2342_v41  ;;  %v592_v39 = vsel %vm371_vm8, %v2390_v0, %v2406_v43 }
 0x18e   :  { %v261_v0 = vmul.f32 %v2175_v23, %v2218_v56  ;;  %v732_v56 = vld [vmem:[%s2937_s5 + $0x8] sm:$0xff] }
 0x190   :  { %v590_v11 = vpop.permute.xlu0 %589 }
 0x191   :  { %836 = vrot.lane.b32.xlu1 %v728_v8, %s1865_s1  ;;  %766 = vrot.lane.b32.xlu0 %v590_v11, %s1865_s1  ;;  %v686_v8 = vsel %vm684_vm13, %v677_v42, %v2360_v28  ;;  %v666_v42 = vsel %vm664_vm14, %v657_v22, %v2362_v1  ;;  %v1080_v28 = vld [vmem:[%s2939_s7] sm:$0xff] }
 0x195   :  { %820 = vrot.lane.b32.xlu1 %v705_v27, %s1865_s1  ;;  %830 = vrot.lane.b32.xlu0 %v725_v9, %s1865_s1  ;;  %v688_v27 = vsel %vm684_vm13, %v681_v24, %v2340_v20  ;;  %v667_v9 = vsel %vm664_vm14, %v2362_v1, %v661_v48  ;;  %v648_v48 = vsel %vm248_vm7, %v2370_v30, %v645_v31 }
 0x196   :  { %v612_v31 = vsel %vm610_vm10, %v2366_v12, %v2399_v10  ;;  %v257_v10 = vmul.f32 0.0, %v2145_v52 }
 0x199   :  { %824 = vrot.lane.b32.xlu1 %v707_v5, %s1865_s1  ;;  %834 = vrot.lane.b32.xlu0 %v727_v25, %s1865_s1  ;;  %v665_v5 = vsel %vm664_vm14, %v2354_v7, %v657_v22  ;;  %v646_v22 = vsel %vm248_vm7, %v2364_v2, %v641_v34  ;;  %v632_v34 = vsel %vm289_vm9, %v625_v16, %v2386_v40 }
 0x19a   :  { %v594_v7 = vsel %vm371_vm8, %v2396_v61, %v590_v11  ;;  %v614_v16 = vsel %vm610_vm10, %v2372_v17, %v2401_v51  ;;  %v593_v11 = vsel %vm371_vm8, %v2406_v43, %v2396_v61  ;;  %v731_v51 = vld [vmem:[%s2937_s5] sm:$0xff]  ;;  %v2506_v61 = vpop.permute.xlu1 %752 }
 0x19d   :  { %812 = vrot.lane.b32.xlu1 %v686_v8, %s1865_s1  ;;  %822 = vrot.lane.b32.xlu0 %v706_v13, %s1865_s1 }
 0x1a1   :  { %816 = vrot.lane.b32.xlu1 %v688_v27, %s1865_s1  ;;  %826 = vrot.lane.b32.xlu0 %v708_v35, %s1865_s1 }
 0x1a5   :  { %800 = vrot.lane.b32.xlu1 %v665_v5, %s1865_s1  ;;  %810 = vrot.lane.b32.xlu0 %v685_v15, %s1865_s1 }
 0x1a9   :  { %804 = vrot.lane.b32.xlu1 %v667_v9, %s1865_s1  ;;  %814 = vrot.lane.b32.xlu0 %v687_v45, %s1865_s1 }
 0x1ad   :  { %792 = vrot.lane.b32.xlu1 %v647_v14, %s1865_s1  ;;  %802 = vrot.lane.b32.xlu0 %v666_v42, %s1865_s1 }
 0x1b1   :  { %780 = vrot.lane.b32.xlu1 %v631_v3, %s1865_s1  ;;  %806 = vrot.lane.b32.xlu0 %v668_v32, %s1865_s1 }
 0x1b5   :  { %784 = vrot.lane.b32.xlu1 %v633_v60, %s1865_s1  ;;  %790 = vrot.lane.b32.xlu0 %v646_v22, %s1865_s1 }
 0x1b9   :  { %772 = vrot.lane.b32.xlu1 %v613_v33, %s1865_s1  ;;  %794 = vrot.lane.b32.xlu0 %v648_v48, %s1865_s1 }
 0x1bd   :  { %760 = vrot.lane.b32.xlu1 %v592_v39, %s1865_s1  ;;  %782 = vrot.lane.b32.xlu0 %v632_v34, %s1865_s1 }
 0x1bf   :  { %v819_v52 = vpop.permute.xlu1 %818  ;;  %v829_v2 = vpop.permute.xlu0 %828 }
 0x1c1   :  { %764 = vrot.lane.b32.xlu1 %v594_v7, %s1865_s1  ;;  %770 = vrot.lane.b32.xlu0 %v612_v31, %s1865_s1 }
 0x1c5   :  { %756 = vrot.lane.b32.xlu1 %v261_v0, %s1865_s1  ;;  %774 = vrot.lane.b32.xlu0 %v614_v16, %s1865_s1 }
 0x1c7   :  { %v799_v1 = vpop.permute.xlu1 %798  ;;  %v809_v30 = vpop.permute.xlu0 %808 }
 0x1c9   :  { %762 = vrot.lane.b32.xlu0 %v593_v11, %s1865_s1  ;;  %740 = vperm.xlu1 %1813, %v732_v56  }
 0x1cd   :  { %748 = vrot.lane.b32.xlu0 %v257_v10, %s1865_s1  ;;  %1083 = vperm.xlu1 %1813, %v1080_v28  }
 0x1cf   :  { %v789_v21 = vpop.permute.xlu0 %788 }
 0x1d1   :  { %735 = vperm.xlu0 %1812, %v731_v51  }
 0x1d3   :  { %v2514_v24 = vpop.permute.xlu0 %768 }
 0x1d8   :  { %v2508_v12 = vpop.permute.xlu1 %778 }
 0x1e0   :  { %v2510_v17 = vpop.permute.xlu1 %758 }
 0x1f3   :  { %v2512_v40 = vpop.permute.xlu1 %796 }
 0x1fb   :  { %v2516_v43 = vpop.permute.xlu1 %776  ;;  %v2518_v25 = vpop.permute.xlu0 %786 }
 0x1ff   :  { %v833_v8 = vpop.permute.xlu1 %832 }
 0x203   :  { %v837_v13 = vpop.permute.xlu1 %836  ;;  %v2520_v27 = vpop.permute.xlu0 %766 }
 0x207   :  { %v821_v35 = vpop.permute.xlu1 %820  ;;  %v831_v5 = vpop.permute.xlu0 %830 }
 0x208   :  { %v871_v15 = vsel %vm562_vm2, %v831_v5, %v833_v8  ;;  %v870_v9 = vsel %vm562_vm2, %v829_v2, %v831_v5  ;;  %v866_v33 = vsel %vm562_vm2, %v819_v52, %v821_v35 }
 0x209   :  { %931 = vmatprep.subr.mxu0 %v871_v15 }
 0x20a   :  { %932 = vmatpush1.msra.mxu0 %v870_v9 }
 0x20b   :  { %v825_v45 = vpop.permute.xlu1 %824  ;;  %v835_v14 = vpop.permute.xlu0 %834 }
 0x20c   :  { %v873_v42 = vsel %vm562_vm2, %v835_v14, %v837_v13  ;;  %v872_v3 = vsel %vm562_vm2, %v833_v8, %v835_v14 }
 0x20d   :  { %1008 = vmatprep.subr.mxu1 %v873_v42 }
 0x20e   :  { %1009 = vmatpush1.msra.mxu1 %v872_v3 }
 0x20f   :  { %v813_v32 = vpop.permute.xlu1 %812  ;;  %v823_v60 = vpop.permute.xlu0 %822 }
 0x210   :  { %v867_v22 = vsel %vm562_vm2, %v821_v35, %v823_v60  ;;  %v868_v7 = vsel %vm562_vm2, %v823_v60, %v825_v45 }
 0x211   :  { %933 = vmatprep.subr.mxu0 %v867_v22 }
 0x212   :  { %934 = vmatpush1.msra.mxu0 %v866_v33 }
 0x213   :  { %v817_v48 = vpop.permute.xlu1 %816  ;;  %v827_v39 = vpop.permute.xlu0 %826 }
 0x214   :  { %v869_v34 = vsel %vm562_vm2, %v825_v45, %v827_v39 }
 0x215   :  { %1010 = vmatprep.subr.mxu1 %v869_v34 }
 0x216   :  { %1011 = vmatpush1.msra.mxu1 %v868_v7 }
 0x217   :  { %v801_v31 = vpop.permute.xlu1 %800  ;;  %v811_v0 = vpop.permute.xlu0 %810 }
 0x218   :  { %v863_v16 = vsel %vm562_vm2, %v811_v0, %v813_v32  ;;  %v862_v11 = vsel %vm562_vm2, %v809_v30, %v811_v0  ;;  %v858_v13 = vsel %vm562_vm2, %v799_v1, %v801_v31 }
 0x219   :  { %935 = vmatprep.subr.mxu0 %v863_v16 }
 0x21a   :  { %936 = vmatpush1.msra.mxu0 %v862_v11 }
 0x21b   :  { %v805_v10 = vpop.permute.xlu1 %804  ;;  %v815_v56 = vpop.permute.xlu0 %814 }
 0x21c   :  { %v865_v51 = vsel %vm562_vm2, %v815_v56, %v817_v48  ;;  %v864_v28 = vsel %vm562_vm2, %v813_v32, %v815_v56 }
 0x21d   :  { %1012 = vmatprep.subr.mxu1 %v865_v51 }
 0x21e   :  { %1013 = vmatpush1.msra.mxu1 %v864_v28 }
 0x21f   :  { %v793_v52 = vpop.permute.xlu1 %792  ;;  %v803_v2 = vpop.permute.xlu0 %802 }
 0x220   :  { %v859_v8 = vsel %vm562_vm2, %v801_v31, %v803_v2  ;;  %v860_v15 = vsel %vm562_vm2, %v803_v2, %v805_v10 }
 0x221   :  { %937 = vmatprep.subr.mxu0 %v859_v8 }
 0x222   :  { %938 = vmatpush1.msra.mxu0 %v858_v13  ;;  %v2986_v13 = vmov 0.0  }
 0x223   :  { %v781_v35 = vpop.permute.xlu1 %780  ;;  %v807_v30 = vpop.permute.xlu0 %806 }
 0x224   :  { %v861_v5 = vsel %vm562_vm2, %v805_v10, %v807_v30  ;;  %v850_v34 = vsel %vm562_vm2, %v2508_v12, %v781_v35 }
 0x225   :  { %1014 = vmatprep.subr.mxu1 %v861_v5 }
 0x226   :  { %1015 = vmatpush1.msra.mxu1 %v860_v15 }
 0x227   :  { %v785_v9 = vpop.permute.xlu1 %784  ;;  %v791_v45 = vpop.permute.xlu0 %790 }
 0x228   :  { %v854_v14 = vsel %vm562_vm2, %v789_v21, %v791_v45  ;;  %v855_v42 = vsel %vm562_vm2, %v791_v45, %v793_v52  ;;  %v853_v22 = vsel %vm562_vm2, %v785_v9, %v2518_v25 }
 0x229   :  { %939 = vmatprep.subr.mxu0 %v855_v42 }
 0x22a   :  { %940 = vmatpush1.msra.mxu0 %v854_v14 }
 0x22b   :  { %v773_v3 = vpop.permute.xlu1 %772  ;;  %v795_v32 = vpop.permute.xlu0 %794 }
 0x22c   :  { %v856_v1 = vsel %vm562_vm2, %v793_v52, %v795_v32  ;;  %v857_v60 = vsel %vm562_vm2, %v795_v32, %v2512_v40  ;;  %v729_v52 = vld [vmem:[%s2936_s4] sm:$0xff] }
 0x22d   :  { %1016 = vmatprep.subr.mxu1 %v857_v60 }
 0x22e   :  { %1017 = vmatpush1.msra.mxu1 %v856_v1 }
 0x22f   :  { %v761_v33 = vpop.permute.xlu1 %760  ;;  %1018 = vmatprep.subr.mxu1 %v853_v22  ;;  %v783_v48 = vpop.permute.xlu0 %782 }
 0x230   :  { %v852_v21 = vsel %vm562_vm2, %v783_v48, %v785_v9  ;;  %v851_v39 = vsel %vm562_vm2, %v781_v35, %v783_v48  ;;  %v842_v28 = vsel %vm562_vm2, %v2510_v17, %v761_v33  ;;  %v840_v17 = vsel %vm562_vm2, %v2506_v61, %v2388_v38  ;;  %v730_v35 = vld [vmem:[%s2936_s4 + $0x8] sm:$0xff] }
 0x231   :  { %941 = vmatprep.subr.mxu0 %v851_v39  ;;  %1019 = vmatpush1.msra.mxu1 %v852_v21 }
 0x232   :  { %942 = vmatpush1.msra.mxu0 %v850_v34 }
 0x233   :  { %v771_v7 = vpop.permute.xlu0 %770  ;;  %v765_v40 = vpop.permute.xlu1 %764 }
 0x234   :  { %v846_v31 = vsel %vm562_vm2, %v2514_v24, %v771_v7  ;;  %v847_v25 = vsel %vm562_vm2, %v771_v7, %v773_v3  ;;  %v845_v10 = vsel %vm562_vm2, %v765_v40, %v2520_v27  ;;  %v839_v27 = vsel %vm562_vm2, %v2380_v26, %v2506_v61 }
 0x235   :  { %943 = vmatprep.subr.mxu0 %v847_v25 }
 0x236   :  { %944 = vmatpush1.msra.mxu0 %v846_v31 }
 0x237   :  { %v775_v0 = vpop.permute.xlu0 %774  ;;  %v757_v12 = vpop.permute.xlu1 %756 }
 0x238   :  { %v848_v16 = vsel %vm562_vm2, %v773_v3, %v775_v0  ;;  %v849_v11 = vsel %vm562_vm2, %v775_v0, %v2516_v43  ;;  %v841_v43 = vsel %vm562_vm2, %v2388_v38, %v757_v12  ;;  %v1079_v0 = vld [vmem:[%s2938_s6] sm:$0xff] }
 0x239   :  { %1020 = vmatprep.subr.mxu1 %v849_v11 }
 0x23a   :  { %1021 = vmatpush1.msra.mxu1 %v848_v16 }
 0x23b   :  { %1022 = vmatprep.subr.mxu1 %v845_v10  ;;  %v763_v56 = vpop.permute.xlu0 %762 }
 0x23c   :  { %v844_v24 = vsel %vm562_vm2, %v763_v56, %v765_v40  ;;  %v843_v51 = vsel %vm562_vm2, %v761_v33, %v763_v56 }
 0x23d   :  { %945 = vmatprep.subr.mxu0 %v843_v51  ;;  %1023 = vmatpush1.msra.mxu1 %v844_v24 }
 0x23e   :  { %946 = vmatpush1.msra.mxu0 %v842_v28  ;;  %1024 = vmatprep.subr.mxu1 %v841_v43 }
 0x23f   :  { %947 = vmatprep.subr.mxu0 %v839_v27  ;;  %1025 = vmatpush1.msra.mxu1 %v840_v17  ;;  %v2572_v2 = vpop.permute.xlu0 %748 }
 0x240   :  { %v838_v8 = vsel %vm562_vm2, %v2572_v2, %v2380_v26  ;;  %1785 = vmatmul.mubr.msk.f32.vlgmr.msra.gmra.mxu1 %vm910_vm15, %v729_v52 }
 0x241   :  { %948 = vmatpush1.msra.mxu0 %v838_v8  ;;  %1064 = vmatprep.mubr.f32.mxu1 %v2986_v13 }
 0x242   :  { %1783 = vmatmul.mubr.msk.f32.vlgmr.msra.gmra.mxu0 %vm910_vm15, %v729_v52 }
 0x243   :  { %987 = vmatprep.mubr.f32.mxu0 %v2986_v13 }
 0x244   :  { %1786 = vmatmul.mubr.msk.f32.gmra.mxu1 %vm910_vm15, %v730_v35  ;;  %v741_v30 = vpop.permute.xlu1 %740 }
 0x245   :  { %1224 = vmatprep.mubr.f32.mxu1 %v2986_v13 }
 0x246   :  { %1784 = vmatmul.mubr.msk.f32.gmra.mxu0 %vm910_vm15, %v730_v35 }
 0x247   :  { %1153 = vmatprep.mubr.f32.mxu0 %v2986_v13 }
 0x248   :  { %v1084_v10 = vpop.permute.xlu1 %1083 }
 0x24c   :  { %v736_v9 = vpop.permute.xlu0 %735 }
 0x300   :  { %v1060_v26 = vpop.f32.mrf.mxu1 }
 0x301   :  { %v2594_v1 = vadd.f32 %v1060_v26, %v736_v9 }
 0x302   :  { %v983_v38 = vpop.f32.mrf.mxu0  ;;  %v1062_v61 = vpop.f32.mrf.mxu1 }
 0x303   :  { %v2590_v3 = vadd.f32 %v1062_v61, %v736_v9  ;;  %v2604_v34 = vadd.f32 %v983_v38, %v736_v9  ;;  %v1073_v31 = vmax.f32 %v2594_v1, 0.0 }
 0x304   :  { %v985_v5 = vpop.f32.mrf.mxu0  ;;  %v1066_v15 = vpop.f32.mrf.mxu1 }
 0x305   :  { %v2588_v45 = vadd.f32 %v1066_v15, %v741_v30  ;;  %v2599_v48 = vadd.f32 %v985_v5, %v736_v9  ;;  %v1074_v7 = vmax.f32 %v2590_v3, 0.0  ;;  %v1071_v11 = vmax.f32 %v2604_v34, 0.0  ;;  %v2987_v15 = vld [vmem:[#allocation12_spill] sm:$0xff] }
 0x306   :  { %v989_v14 = vpop.f32.mrf.mxu0  ;;  %v1068_v42 = vpop.f32.mrf.mxu1  ;;  %v2988_v9 = vld [vmem:[#allocation20_spill] sm:$0xff] }
 0x307   :  { %v2592_v32 = vadd.f32 %v1068_v42, %v741_v30  ;;  %v1077_v60 = vmax.f32 %v2588_v45, 0.0  ;;  %v2597_v22 = vadd.f32 %v989_v14, %v741_v30  ;;  %v1072_v16 = vmax.f32 %v2599_v48, 0.0  ;;  %v2989_v14 = vld [vmem:[#allocation15_spill] sm:$0xff]  ;;  %v2990_v42 = vld [vmem:[#allocation22_spill] sm:$0xff] }
 0x308   :  { %v991_v33 = vpop.f32.mrf.mxu0 }
 0x309   :  { %v2965_v21 = vmax.f32 %v2592_v32, 0.0  ;;  %v2602_v39 = vadd.f32 %v991_v33, %v741_v30  ;;  %v1075_v25 = vmax.f32 %v2597_v22, 0.0  ;;  %v2991_v33 = vld [vmem:[#allocation17_spill] sm:$0xff] }
 0x30b   :  { %v1076_v40 = vmax.f32 %v2602_v39, 0.0  ;;  %1188 = vmatprep.subr.mxu1 %v2965_v21 }
 0x30c   :  { %1189 = vmatpush1.msra.mxu1 %v1077_v60 }
 0x30d   :  { %1117 = vmatprep.subr.mxu0 %v1076_v40  ;;  %1190 = vmatprep.subr.mxu1 %v1074_v7 }
 0x30e   :  { %1118 = vmatpush1.msra.mxu0 %v1075_v25  ;;  %1191 = vmatpush1.msra.mxu1 %v1073_v31 }
 0x30f   :  { %1119 = vmatprep.subr.mxu0 %v1072_v16  ;;  %1788 = vmatmul.mubr.msk.f32.vlgmr.msra.gmra.mxu1 %vm521_vm3, %v1079_v0 }
 0x310   :  { %1120 = vmatpush1.msra.mxu0 %v1071_v11  ;;  %1723 = vmatprep.mubr.f32.mxu1 %v2986_v13 }
 0x311   :  { %1787 = vmatmul.mubr.msk.f32.vlgmr.msra.gmra.mxu0 %vm521_vm3, %v1079_v0 }
 0x312   :  { %1646 = vmatprep.mubr.f32.mxu0 %v2986_v13 }
 0x3cf   :  { %v1226_v12 = vpop.f32.mrf.mxu1 }
 0x3d0   :  { %v1227_v51 = vadd.f32 %v1226_v12, %v1084_v10  ;;  %v2992_v12 = vld [vmem:[#allocation8_spill] sm:$0xff] }
 0x3d1   :  { %v1155_v56 = vpop.f32.mrf.mxu0  ;;  %v1228_v24 = vpop.f32.mrf.mxu1 }
 0x3d2   :  { %v1156_v28 = vadd.f32 %v1155_v56, %v1084_v10  ;;  %v1229_v27 = vadd.f32 %v1228_v24, %v1084_v10  ;;  %v2637_v8 = vmax.f32 %v1227_v51, 0.0  ;;  %v2993_v56 = vld [vmem:[#allocation11_spill] sm:$0xff]  ;;  %v2994_v51 = vld [vmem:[#allocation21_spill] sm:$0xff] }
 0x3d3   :  { %v1157_v43 = vpop.f32.mrf.mxu0 }
 0x3d4   :  { %v2635_v52 = vmax.f32 %v1156_v28, 0.0  ;;  %v1158_v17 = vadd.f32 %v1157_v43, %v1084_v10  ;;  %v2643_v38 = vmax.f32 %v1229_v27, 0.0  ;;  %v1269_v30 = vmul.f32 %v2637_v8, %v2094_v36  ;;  %v2995_v43 = vld [vmem:[#allocation13_spill] sm:$0xff] }
 0x3d5   :  { %v1265_v36 = vmul.f32 %v2637_v8, %v2099_v37  ;;  %v1261_v37 = vmul.f32 %v2637_v8, %v2124_v46  ;;  %v1257_v46 = vmul.f32 %v2637_v8, %v2129_v47  ;;  %v1253_v47 = vmul.f32 %v2637_v8, %v2987_v15 }
 0x3d6   :  { %v2639_v35 = vmax.f32 %v1158_v17, 0.0  ;;  %v1267_v26 = vmul.f32 %v2635_v52, %v2024_v58  ;;  %v1270_v5 = vmul.f32 %v2643_v38, %v2233_v54  ;;  %v1263_v58 = vmul.f32 %v2635_v52, %v2022_v57  ;;  %v2996_v17 = vld [vmem:[#allocation9_spill] sm:$0xff] }
 0x3d7   :  { %v1266_v54 = vmul.f32 %v2643_v38, %v2258_v19  ;;  %v1259_v57 = vmul.f32 %v2635_v52, %v2031_v62  ;;  %v1262_v19 = vmul.f32 %v2643_v38, %v2263_v63  ;;  %v1255_v62 = vmul.f32 %v2635_v52, %v2041_v6 }
 0x3d8   :  { %1386 = vrot.lane.b32.xlu0 %v1267_v26, %s1873_s12  ;;  %v1268_v61 = vmul.f32 %v2639_v35, %v2216_v49  ;;  %v1264_v49 = vmul.f32 %v2639_v35, %v2244_v18  ;;  %v1260_v18 = vmul.f32 %v2639_v35, %v2249_v55  ;;  %v1256_v55 = vmul.f32 %v2639_v35, %v2278_v59 }
 0x3d9   :  { %v1258_v63 = vmul.f32 %v2643_v38, %v2291_v4  ;;  %v1251_v6 = vmul.f32 %v2635_v52, %v2137_v50  ;;  %v1252_v59 = vmul.f32 %v2639_v35, %v2271_v29  ;;  %v1254_v4 = vmul.f32 %v2643_v38, %v2988_v9 }
 0x3da   :  { %1388 = vrot.lane.b32.xlu1 %v1268_v61, %s1873_s12  ;;  %v1247_v50 = vmul.f32 %v2635_v52, %v2989_v14  ;;  %v1248_v29 = vmul.f32 %v2639_v35, %v2990_v42  ;;  %v1249_v0 = vmul.f32 %v2637_v8, %v2991_v33  ;;  %v1250_v10 = vmul.f32 %v2643_v38, %v2992_v12  ;;  %v2997_v61 = vld [vmem:[#allocation18_spill] sm:$0xff] }
 0x3db   :  { %v1243_v24 = vmul.f32 %v2635_v52, %v2993_v56  ;;  %v1244_v28 = vmul.f32 %v2639_v35, %v2994_v51  ;;  %v1245_v27 = vmul.f32 %v2637_v8, %v2995_v43  ;;  %v1246_v26 = vmul.f32 %v2643_v38, %v2996_v17 }
 0x3dc   :  { %1390 = vrot.lane.b32.xlu0 %v1269_v30, %s1873_s12  ;;  %v1239_v30 = vmul.f32 %v2635_v52, %v2997_v61 }
 0x3de   :  { %1392 = vrot.lane.b32.xlu1 %v1270_v5, %s1873_s12  ;;  %v2998_v5 = vld [vmem:[#allocation23_spill] sm:$0xff] }
 0x3e0   :  { %1370 = vrot.lane.b32.xlu0 %v1263_v58, %s1874_s13  ;;  %v1240_v58 = vmul.f32 %v2639_v35, %v2998_v5 }
 0x3e2   :  { %1372 = vrot.lane.b32.xlu1 %v1264_v49, %s1874_s13  ;;  %v2999_v49 = vld [vmem:[#allocation19_spill] sm:$0xff] }
 0x3e4   :  { %1374 = vrot.lane.b32.xlu0 %v1265_v36, %s1874_s13  ;;  %v1241_v36 = vmul.f32 %v2637_v8, %v2999_v49 }
 0x3e6   :  { %1376 = vrot.lane.b32.xlu1 %v1266_v54, %s1874_s13  ;;  %v3000_v54 = vld [vmem:[#allocation10_spill] sm:$0xff] }
 0x3e8   :  { %1354 = vrot.lane.b32.xlu0 %v1259_v57, %s1875_s14  ;;  %v1242_v57 = vmul.f32 %v2643_v38, %v3000_v54 }
 0x3ea   :  { %1356 = vrot.lane.b32.xlu1 %v1260_v18, %s1875_s14  ;;  %v3001_v18 = vld [vmem:[#allocation14_spill] sm:$0xff] }
 0x3ec   :  { %1358 = vrot.lane.b32.xlu0 %v1261_v37, %s1875_s14  ;;  %v1235_v37 = vmul.f32 %v2635_v52, %v3001_v18 }
 0x3ee   :  { %1360 = vrot.lane.b32.xlu1 %v1262_v19, %s1875_s14  ;;  %v3002_v19 = vld [vmem:[#allocation24_spill] sm:$0xff] }
 0x3f0   :  { %1338 = vrot.lane.b32.xlu0 %v1255_v62, %s1876_s15  ;;  %v1236_v62 = vmul.f32 %v2639_v35, %v3002_v19 }
 0x3f2   :  { %1340 = vrot.lane.b32.xlu1 %v1256_v55, %s1876_s15 }
 0x3f4   :  { %1342 = vrot.lane.b32.xlu0 %v1257_v46, %s1876_s15 }
 0x3f6   :  { %1344 = vrot.lane.b32.xlu1 %v1258_v63, %s1876_s15 }
 0x3f8   :  { %1323 = vrot.lane.b32.xlu0 %v1251_v6, %s1872_s11 }
 0x3fa   :  { %1325 = vrot.lane.b32.xlu1 %v1252_v59, %s1872_s11 }
 0x3fc   :  { %1327 = vrot.lane.b32.xlu0 %v1253_v47, %s1872_s11 }
 0x3fe   :  { %1329 = vrot.lane.b32.xlu1 %v1254_v4, %s1872_s11 }
 0x400   :  { %1307 = vrot.lane.b32.xlu0 %v1247_v50, %s1871_s30 }
 0x402   :  { %1309 = vrot.lane.b32.xlu1 %v1248_v29, %s1871_s30 }
 0x404   :  { %1311 = vrot.lane.b32.xlu0 %v1249_v0, %s1871_s30 }
 0x406   :  { %1313 = vrot.lane.b32.xlu1 %v1250_v10, %s1871_s30 }
 0x408   :  { %1291 = vrot.lane.b32.xlu0 %v1243_v24, %s1877_s18 }
 0x40a   :  { %1293 = vrot.lane.b32.xlu1 %v1244_v28, %s1877_s18 }
 0x40c   :  { %1295 = vrot.lane.b32.xlu0 %v1245_v27, %s1877_s18 }
 0x40e   :  { %1297 = vrot.lane.b32.xlu1 %v1246_v26, %s1877_s18 }
 0x410   :  { %1275 = vrot.lane.b32.xlu0 %v1239_v30, %s1869_s28  ;;  %v3003_v30 = vld [vmem:[#allocation25_spill] sm:$0xff] }
 0x412   :  { %1277 = vrot.lane.b32.xlu1 %v1240_v58, %s1869_s28 }
 0x414   :  { %1279 = vrot.lane.b32.xlu0 %v1241_v36, %s1869_s28 }
 0x416   :  { %1281 = vrot.lane.b32.xlu1 %v1242_v57, %s1869_s28  ;;  %v3004_v57 = vld [vmem:[#allocation27_spill] sm:$0xff] }
 0x418   :  { %1416 = vrot.lane.b32.xlu0 %v1235_v37, %s1865_s1 }
 0x41a   :  { %1418 = vrot.lane.b32.xlu1 %v1236_v62, %s1865_s1 }
 0x44a   :  { %v1387_v55 = vpop.permute.xlu0 %1386 }
 0x44b   :  { %1494 = vrot.lane.b32.xlu0 %v1387_v55, %s1865_s1 }
 0x44c   :  { %v1389_v46 = vpop.permute.xlu1 %1388 }
 0x44e   :  { %v1391_v63 = vpop.permute.xlu0 %1390 }
 0x44f   :  { %v1395_v6 = vsel %vm724_vm11, %v1389_v46, %v1391_v63 }
 0x450   :  { %v1393_v59 = vpop.permute.xlu1 %1392 }
 0x452   :  { %v1371_v15 = vpop.permute.xlu0 %1370 }
 0x453   :  { %1484 = vrot.lane.b32.xlu1 %v1371_v15, %s1865_s1 }
 0x454   :  { %v1373_v47 = vpop.permute.xlu1 %1372 }
 0x455   :  { %v1378_v52 = vsel %vm704_vm12, %v1371_v15, %v1373_v47 }
 0x456   :  { %v1375_v9 = vpop.permute.xlu0 %1374 }
 0x458   :  { %v1377_v4 = vpop.permute.xlu1 %1376 }
 0x459   :  { %v1380_v35 = vsel %vm704_vm12, %v1375_v9, %v1377_v4 }
 0x45a   :  { %v1355_v14 = vpop.permute.xlu0 %1354 }
 0x45b   :  { %1474 = vrot.lane.b32.xlu0 %v1355_v14, %s1865_s1 }
 0x45c   :  { %v1357_v50 = vpop.permute.xlu1 %1356 }
 0x45e   :  { %v1359_v42 = vpop.permute.xlu0 %1358 }
 0x45f   :  { %v1363_v29 = vsel %vm684_vm13, %v1357_v50, %v1359_v42 }
 0x460   :  { %v1361_v33 = vpop.permute.xlu1 %1360 }
 0x462   :  { %v1339_v0 = vpop.permute.xlu0 %1338 }
 0x463   :  { %1464 = vrot.lane.b32.xlu1 %v1339_v0, %s1865_s1 }
 0x464   :  { %v1341_v12 = vpop.permute.xlu1 %1340 }
 0x465   :  { %v1346_v10 = vsel %vm664_vm14, %v1339_v0, %v1341_v12  ;;  %v3005_v0 = vld [vmem:[#allocation26_spill] sm:$0xff] }
 0x466   :  { %v1343_v56 = vpop.permute.xlu0 %1342 }
 0x468   :  { %v1345_v24 = vpop.permute.xlu1 %1344 }
 0x469   :  { %v1348_v51 = vsel %vm664_vm14, %v1343_v56, %v1345_v24 }
 0x46a   :  { %v1324_v28 = vpop.permute.xlu0 %1323 }
 0x46b   :  { %1454 = vrot.lane.b32.xlu0 %v1324_v28, %s1865_s1 }
 0x46c   :  { %v1326_v43 = vpop.permute.xlu1 %1325 }
 0x46e   :  { %v1328_v27 = vpop.permute.xlu0 %1327 }
 0x46f   :  { %v1332_v17 = vsel %vm248_vm7, %v1326_v43, %v1328_v27 }
 0x470   :  { %v1330_v26 = vpop.permute.xlu1 %1329 }
 0x472   :  { %v1308_v61 = vpop.permute.xlu0 %1307 }
 0x473   :  { %v1315_v5 = vsel %vm289_vm9, %v3003_v30, %v1308_v61 }
 0x474   :  { %v1310_v58 = vpop.permute.xlu1 %1309  ;;  %1444 = vrot.lane.b32.xlu1 %v1315_v5, %s1865_s1 }
 0x476   :  { %v1312_v49 = vpop.permute.xlu0 %1311 }
 0x478   :  { %v1314_v36 = vpop.permute.xlu1 %1313 }
 0x47a   :  { %v1292_v54 = vpop.permute.xlu0 %1291 }
 0x47b   :  { %v1299_v18 = vsel %vm610_vm10, %v3004_v57, %v1292_v54  ;;  %v1394_v57 = vsel %vm724_vm11, %v1387_v55, %v1389_v46  ;;  %v1381_v55 = vsel %vm704_vm12, %v1377_v4, %v2338_v53  ;;  %v1362_v46 = vsel %vm684_vm13, %v1355_v14, %v1357_v50 }
 0x47c   :  { %v1294_v37 = vpop.permute.xlu1 %1293  ;;  %1434 = vrot.lane.b32.xlu0 %v1299_v18, %s1865_s1  ;;  %v1396_v18 = vsel %vm724_vm11, %v1391_v63, %v1393_v59  ;;  %v1365_v63 = vsel %vm684_vm13, %v1361_v33, %v2340_v20  ;;  %v1347_v53 = vsel %vm664_vm14, %v1341_v12, %v1343_v56  ;;  %v1333_v20 = vsel %vm248_vm7, %v1328_v27, %v1330_v26  ;;  %v1401_v56 = vld [vmem:[%s2941_s9 + $0x8] sm:$0xff] }
 0x47e   :  { %v1296_v19 = vpop.permute.xlu0 %1295 }
 0x47f   :  { %v1301_v4 = vsel %vm610_vm10, %v1294_v37, %v1296_v19 }
 0x480   :  { %v1298_v62 = vpop.permute.xlu1 %1297  ;;  %1452 = vrot.lane.b32.xlu0 %v1314_v36, %s1865_s1 }
 0x482   :  { %v1276_v15 = vpop.permute.xlu0 %1275 }
 0x483   :  { %v1283_v30 = vsel %vm371_vm8, %v3005_v0, %v1276_v15  ;;  %v1397_v0 = vsel %vm724_vm11, %v1393_v59, %v2336_v44  ;;  %v1364_v44 = vsel %vm684_vm13, %v1359_v42, %v1361_v33  ;;  %v1331_v59 = vsel %vm248_vm7, %v1324_v28, %v1326_v43  ;;  %v3006_v33 = vld [vmem:[#allocation16_spill] sm:$0xff] }
 0x484   :  { %v1278_v21 = vpop.permute.xlu1 %1277  ;;  %1424 = vrot.lane.b32.xlu1 %v1283_v30, %s1865_s1  ;;  %v1379_v30 = vsel %vm704_vm12, %v1373_v47, %v1375_v9  ;;  %v1316_v47 = vsel %vm289_vm9, %v1308_v61, %v1310_v58  ;;  %v1300_v9 = vsel %vm610_vm10, %v1292_v54, %v1294_v37  ;;  %v1237_v12 = vmul.f32 %v2637_v8, %v3006_v33 }
 0x485   :  { %v1284_v50 = vsel %vm371_vm8, %v1276_v15, %v1278_v21 }
 0x486   :  { %v1280_v14 = vpop.permute.xlu0 %1279 }
 0x487   :  { %v1285_v42 = vsel %vm371_vm8, %v1278_v21, %v1280_v14  ;;  %v1400_v21 = vld [vmem:[%s2941_s9] sm:$0xff] }
 0x488   :  { %v1282_v5 = vpop.permute.xlu1 %1281  ;;  %1462 = vrot.lane.b32.xlu1 %v1330_v26, %s1865_s1 }
 0x489   :  { %1432 = vrot.lane.b32.xlu0 %v1282_v5, %s1865_s1 }
 0x48a   :  { %v2835_v8 = vpop.permute.xlu0 %1416 }
 0x48c   :  { %1442 = vrot.lane.b32.xlu1 %v1298_v62, %s1865_s1 }
 0x48d   :  { %1496 = vrot.lane.b32.xlu0 %v1394_v57, %s1865_s1 }
 0x490   :  { %1498 = vrot.lane.b32.xlu1 %v1395_v6, %s1865_s1  ;;  %v1349_v6 = vsel %vm664_vm14, %v1345_v24, %v2342_v41  ;;  %v1317_v41 = vsel %vm289_vm9, %v1310_v58, %v1312_v49 }
 0x491   :  { %1500 = vrot.lane.b32.xlu0 %v1396_v18, %s1865_s1 }
 0x494   :  { %1502 = vrot.lane.b32.xlu1 %v1397_v0, %s1865_s1 }
 0x495   :  { %1488 = vrot.lane.b32.xlu0 %v1379_v30, %s1865_s1 }
 0x498   :  { %1486 = vrot.lane.b32.xlu1 %v1378_v52, %s1865_s1  ;;  %v1318_v52 = vsel %vm289_vm9, %v1312_v49, %v1314_v36 }
 0x499   :  { %1492 = vrot.lane.b32.xlu0 %v1381_v55, %s1865_s1 }
 0x49c   :  { %1490 = vrot.lane.b32.xlu1 %v1380_v35, %s1865_s1  ;;  %v1302_v35 = vsel %vm610_vm10, %v1296_v19, %v1298_v62 }
 0x49d   :  { %1476 = vrot.lane.b32.xlu0 %v1362_v46, %s1865_s1 }
 0x4a0   :  { %1478 = vrot.lane.b32.xlu1 %v1363_v29, %s1865_s1  ;;  %v1286_v29 = vsel %vm371_vm8, %v1280_v14, %v1282_v5 }
 0x4a1   :  { %1480 = vrot.lane.b32.xlu0 %v1364_v44, %s1865_s1 }
 0x4a4   :  { %1482 = vrot.lane.b32.xlu1 %v1365_v63, %s1865_s1 }
 0x4a5   :  { %1468 = vrot.lane.b32.xlu0 %v1347_v53, %s1865_s1 }
 0x4a8   :  { %1466 = vrot.lane.b32.xlu1 %v1346_v10, %s1865_s1  ;;  %v1238_v10 = vmul.f32 %v2643_v38, %v2175_v23 }
 0x4a9   :  { %1472 = vrot.lane.b32.xlu0 %v1349_v6, %s1865_s1 }
 0x4ac   :  { %1470 = vrot.lane.b32.xlu1 %v1348_v51, %s1865_s1  ;;  %v2837_v51 = vpop.permute.xlu1 %1418 }
 0x4ad   :  { %1456 = vrot.lane.b32.xlu0 %v1331_v59, %s1865_s1 }
 0x4b0   :  { %1458 = vrot.lane.b32.xlu1 %v1332_v17, %s1865_s1 }
 0x4b1   :  { %1460 = vrot.lane.b32.xlu0 %v1333_v20, %s1865_s1 }
 0x4b4   :  { %1446 = vrot.lane.b32.xlu1 %v1316_v47, %s1865_s1 }
 0x4b5   :  { %1448 = vrot.lane.b32.xlu0 %v1317_v41, %s1865_s1 }
 0x4b8   :  { %1450 = vrot.lane.b32.xlu1 %v1318_v52, %s1865_s1 }
 0x4b9   :  { %1436 = vrot.lane.b32.xlu0 %v1300_v9, %s1865_s1 }
 0x4bc   :  { %1438 = vrot.lane.b32.xlu1 %v1301_v4, %s1865_s1 }
 0x4bd   :  { %1440 = vrot.lane.b32.xlu0 %v1302_v35, %s1865_s1  ;;  %v1495_v24 = vpop.permute.xlu0 %1494 }
 0x4c0   :  { %1426 = vrot.lane.b32.xlu1 %v1284_v50, %s1865_s1 }
 0x4c1   :  { %1428 = vrot.lane.b32.xlu0 %v1285_v42, %s1865_s1 }
 0x4c4   :  { %1430 = vrot.lane.b32.xlu1 %v1286_v29, %s1865_s1 }
 0x4c5   :  { %1420 = vrot.lane.b32.xlu0 %v1237_v12, %s1865_s1  ;;  %v1485_v43 = vpop.permute.xlu1 %1484 }
 0x4c8   :  { %1422 = vrot.lane.b32.xlu1 %v1238_v10, %s1865_s1 }
 0x4c9   :  { %1404 = vperm.xlu0 %1812, %v1400_v21  }
 0x4cc   :  { %1409 = vperm.xlu1 %1813, %v1401_v56  }
 0x4cd   :  { %v1475_v28 = vpop.permute.xlu0 %1474 }
 0x4d5   :  { %v1465_v38 = vpop.permute.xlu1 %1464 }
 0x4dd   :  { %v1455_v23 = vpop.permute.xlu0 %1454 }
 0x4e6   :  { %v2841_v17 = vpop.permute.xlu1 %1444 }
 0x4ee   :  { %v2839_v27 = vpop.permute.xlu0 %1434 }
 0x4f2   :  { %v2845_v61 = vpop.permute.xlu0 %1452 }
 0x4f6   :  { %v2843_v26 = vpop.permute.xlu1 %1424 }
 0x4fa   :  { %v1463_v58 = vpop.permute.xlu1 %1462 }
 0x4fb   :  { %v2847_v49 = vpop.permute.xlu0 %1432 }
 0x4fe   :  { %v2849_v36 = vpop.permute.xlu1 %1442 }
 0x4ff   :  { %v1497_v54 = vpop.permute.xlu0 %1496 }
 0x500   :  { %v1536_v15 = vsel %vm562_vm2, %v1495_v24, %v1497_v54 }
 0x502   :  { %v1499_v37 = vpop.permute.xlu1 %1498 }
 0x503   :  { %v1501_v19 = vpop.permute.xlu0 %1500  ;;  %v1537_v62 = vsel %vm562_vm2, %v1497_v54, %v1499_v37 }
 0x504   :  { %1596 = vmatprep.subr.mxu0 %v1537_v62  ;;  %v1538_v0 = vsel %vm562_vm2, %v1499_v37, %v1501_v19 }
 0x505   :  { %1597 = vmatpush1.msra.mxu0 %v1536_v15 }
 0x506   :  { %v1503_v5 = vpop.permute.xlu1 %1502 }
 0x507   :  { %v1489_v57 = vpop.permute.xlu0 %1488  ;;  %v1539_v18 = vsel %vm562_vm2, %v1501_v19, %v1503_v5 }
 0x508   :  { %1673 = vmatprep.subr.mxu1 %v1539_v18 }
 0x509   :  { %1674 = vmatpush1.msra.mxu1 %v1538_v0 }
 0x50a   :  { %v1487_v30 = vpop.permute.xlu1 %1486 }
 0x50b   :  { %v1532_v55 = vsel %vm562_vm2, %v1485_v43, %v1487_v30  ;;  %v1493_v46 = vpop.permute.xlu0 %1492  ;;  %v1533_v44 = vsel %vm562_vm2, %v1487_v30, %v1489_v57 }
 0x50c   :  { %1598 = vmatprep.subr.mxu0 %v1533_v44 }
 0x50d   :  { %1599 = vmatpush1.msra.mxu0 %v1532_v55 }
 0x50e   :  { %v1491_v63 = vpop.permute.xlu1 %1490 }
 0x50f   :  { %v1534_v53 = vsel %vm562_vm2, %v1489_v57, %v1491_v63  ;;  %v1477_v6 = vpop.permute.xlu0 %1476  ;;  %v1535_v59 = vsel %vm562_vm2, %v1491_v63, %v1493_v46 }
 0x510   :  { %1675 = vmatprep.subr.mxu1 %v1535_v59  ;;  %v1528_v52 = vsel %vm562_vm2, %v1475_v28, %v1477_v6 }
 0x511   :  { %1676 = vmatpush1.msra.mxu1 %v1534_v53 }
 0x512   :  { %v1479_v20 = vpop.permute.xlu1 %1478 }
 0x513   :  { %v1481_v47 = vpop.permute.xlu0 %1480  ;;  %v1529_v41 = vsel %vm562_vm2, %v1477_v6, %v1479_v20 }
 0x514   :  { %1600 = vmatprep.subr.mxu0 %v1529_v41  ;;  %v1530_v14 = vsel %vm562_vm2, %v1479_v20, %v1481_v47  ;;  %v1504_v20 = vsel %vm562_vm2, %v2572_v2, %v2835_v8 }
 0x515   :  { %1601 = vmatpush1.msra.mxu0 %v1528_v52 }
 0x516   :  { %v1483_v9 = vpop.permute.xlu1 %1482 }
 0x517   :  { %v1469_v4 = vpop.permute.xlu0 %1468  ;;  %v1531_v35 = vsel %vm562_vm2, %v1481_v47, %v1483_v9  ;;  %v1399_v9 = vld [vmem:[%s2940_s8 + $0x8] sm:$0xff] }
 0x518   :  { %1677 = vmatprep.subr.mxu1 %v1531_v35 }
 0x519   :  { %1678 = vmatpush1.msra.mxu1 %v1530_v14 }
 0x51a   :  { %v1467_v50 = vpop.permute.xlu1 %1466 }
 0x51b   :  { %v1524_v42 = vsel %vm562_vm2, %v1465_v38, %v1467_v50  ;;  %v1473_v29 = vpop.permute.xlu0 %1472  ;;  %v1525_v33 = vsel %vm562_vm2, %v1467_v50, %v1469_v4 }
 0x51c   :  { %1602 = vmatprep.subr.mxu0 %v1525_v33 }
 0x51d   :  { %1603 = vmatpush1.msra.mxu0 %v1524_v42 }
 0x51e   :  { %v1471_v12 = vpop.permute.xlu1 %1470 }
 0x51f   :  { %v1526_v10 = vsel %vm562_vm2, %v1469_v4, %v1471_v12  ;;  %v1457_v21 = vpop.permute.xlu0 %1456  ;;  %v1527_v56 = vsel %vm562_vm2, %v1471_v12, %v1473_v29 }
 0x520   :  { %1679 = vmatprep.subr.mxu1 %v1527_v56  ;;  %v1520_v54 = vsel %vm562_vm2, %v1455_v23, %v1457_v21 }
 0x521   :  { %1680 = vmatpush1.msra.mxu1 %v1526_v10 }
 0x522   :  { %v1459_v24 = vpop.permute.xlu1 %1458 }
 0x523   :  { %v1461_v28 = vpop.permute.xlu0 %1460  ;;  %v1521_v43 = vsel %vm562_vm2, %v1457_v21, %v1459_v24 }
 0x524   :  { %v1522_v38 = vsel %vm562_vm2, %v1459_v24, %v1461_v28  ;;  %1604 = vmatprep.subr.mxu0 %v1521_v43  ;;  %v1523_v37 = vsel %vm562_vm2, %v1461_v28, %v1463_v58 }
 0x525   :  { %1605 = vmatpush1.msra.mxu0 %v1520_v54  ;;  %1681 = vmatprep.subr.mxu1 %v1523_v37 }
 0x526   :  { %v1447_v19 = vpop.permute.xlu1 %1446  ;;  %1682 = vmatpush1.msra.mxu1 %v1522_v38 }
 0x527   :  { %v1449_v62 = vpop.permute.xlu0 %1448  ;;  %v1516_v5 = vsel %vm562_vm2, %v2841_v17, %v1447_v19 }
 0x528   :  { %v1517_v15 = vsel %vm562_vm2, %v1447_v19, %v1449_v62 }
 0x529   :  { %1606 = vmatprep.subr.mxu0 %v1517_v15 }
 0x52a   :  { %v1451_v57 = vpop.permute.xlu1 %1450  ;;  %1607 = vmatpush1.msra.mxu0 %v1516_v5 }
 0x52b   :  { %v1518_v23 = vsel %vm562_vm2, %v1449_v62, %v1451_v57  ;;  %v1437_v18 = vpop.permute.xlu0 %1436  ;;  %v1519_v0 = vsel %vm562_vm2, %v1451_v57, %v2845_v61 }
 0x52c   :  { %1683 = vmatprep.subr.mxu1 %v1519_v0  ;;  %v1512_v46 = vsel %vm562_vm2, %v2839_v27, %v1437_v18  ;;  %v1505_v27 = vsel %vm562_vm2, %v2835_v8, %v2837_v51 }
 0x52d   :  { %1684 = vmatpush1.msra.mxu1 %v1518_v23 }
 0x52e   :  { %v1439_v58 = vpop.permute.xlu1 %1438 }
 0x52f   :  { %v1441_v30 = vpop.permute.xlu0 %1440  ;;  %v1513_v55 = vsel %vm562_vm2, %v1437_v18, %v1439_v58 }
 0x530   :  { %v1514_v17 = vsel %vm562_vm2, %v1439_v58, %v1441_v30  ;;  %1608 = vmatprep.subr.mxu0 %v1513_v55  ;;  %v1515_v44 = vsel %vm562_vm2, %v1441_v30, %v2849_v36  ;;  %v1398_v36 = vld [vmem:[%s2940_s8] sm:$0xff]  ;;  %s1878_s8 = smov [#allocation5]  }
 0x531   :  { %1609 = vmatpush1.msra.mxu0 %v1512_v46  ;;  %1685 = vmatprep.subr.mxu1 %v1515_v44  ;;  %s1765_s30 = sshll.u32 %s1878_s8, 4  ;;  %s1766_s30 = int_to_ptr.vmem [resolvable:$true] %s1765_s30 }
 0x532   :  { %v1427_v63 = vpop.permute.xlu1 %1426  ;;  %1686 = vmatpush1.msra.mxu1 %v1514_v17  ;;  %s1836_s11 = scalar_lea.vmem %s1766_s30, 1024  ;;  %p1841_p6 = scmp.lt.s32.totalorder %s1766_s30, %s1766_s30 }
 0x533   :  { %v1429_v61 = vpop.permute.xlu0 %1428  ;;  %v1508_v6 = vsel %vm562_vm2, %v2843_v26, %v1427_v63  ;;  %p1837_p5 = scmp.ne.s32.totalorder %s1766_s30, %s1836_s11  ;;  %p1842_p7 = scmp.lt.s32.totalorder %s1836_s11, %s1836_s11 }
 0x534   :  { %v1509_v53 = vsel %vm562_vm2, %v1427_v63, %v1429_v61 }
 0x535   :  { %1610 = vmatprep.subr.mxu0 %v1509_v53  ;;  %p1843_p8 = por %p1842_p7, %p1841_p6 }
 0x536   :  { %v1431_v59 = vpop.permute.xlu1 %1430  ;;  %1611 = vmatpush1.msra.mxu0 %v1508_v6 }
 0x537   :  { %v1510_v47 = vsel %vm562_vm2, %v1429_v61, %v1431_v59  ;;  %1612 = vmatprep.subr.mxu0 %v1505_v27  ;;  %v1511_v26 = vsel %vm562_vm2, %v1431_v59, %v2847_v49  ;;  %v1421_v41 = vpop.permute.xlu0 %1420  ;;  %p1844_p9 = pnand %p1843_p8, %p1837_p5 }
 0x538   :  { %1613 = vmatpush1.msra.mxu0 %v1504_v20  ;;  %1687 = vmatprep.subr.mxu1 %v1511_v26  ;;  %v1506_v8 = vsel %vm562_vm2, %v2837_v51, %v1421_v41 }
 0x539   :  { %1789 = vmatmul.mubr.msk.f32.vlgmr.msra.gmra.mxu0 %vm910_vm15, %v1398_v36  ;;  %1688 = vmatpush1.msra.mxu1 %v1510_v47 }
 0x53a   :  { %v1423_v52 = vpop.permute.xlu1 %1422  ;;  %1652 = vmatprep.mubr.f32.mxu0 %v2986_v13 }
 0x53b   :  { %v1507_v2 = vsel %vm562_vm2, %v1421_v41, %v1423_v52 }
 0x53c   :  { %1689 = vmatprep.subr.mxu1 %v1507_v2 }
 0x53d   :  { %1790 = vmatmul.mubr.msk.f32.gmra.mxu0 %vm910_vm15, %v1399_v9  ;;  %1690 = vmatpush1.msra.mxu1 %v1506_v8 }
 0x53e   :  { %1791 = vmatmul.mubr.msk.f32.vlgmr.msra.gmra.mxu1 %vm910_vm15, %v1398_v36 }
 0x53f   :  { %1729 = vmatprep.mubr.f32.mxu1 %v2986_v13 }
 0x542   :  { %1792 = vmatmul.mubr.msk.f32.gmra.mxu1 %vm910_vm15, %v1399_v9 }
 0x544   :  { %v1405_v49 = vpop.permute.xlu0 %1404 }
 0x547   :  { %v1410_v29 = vpop.permute.xlu1 %1409 }
 0x5f9   :  { %v1648_v4 = vpop.f32.mrf.mxu0 }
 0x5fa   :  { %v1649_v35 = vadd.f32 %v1648_v4, %v1405_v49 }
 0x5fb   :  { %v1650_v14 = vpop.f32.mrf.mxu0 }
 0x5fc   :  { %v1736_v50 = vmax.f32 %v1649_v35, 0.0  ;;  %v1651_v42 = vadd.f32 %v1650_v14, %v1405_v49 }
 0x5fd   :  { %v1654_v33 = vpop.f32.mrf.mxu0 }
 0x5fe   :  { %v1744_v51 = vadd.f32 %v1736_v50, %v1071_v11  ;;  %v1737_v12 = vmax.f32 %v1651_v42, 0.0  ;;  %v1655_v10 = vadd.f32 %v1654_v33, %v1410_v29  ;;  %v1725_v21 = vpop.f32.mrf.mxu1 }
 0x5ff   :  { %v1726_v56 = vadd.f32 %v1725_v21, %v1405_v49  ;;  %v1656_v24 = vpop.f32.mrf.mxu0 }
 0x600   :  { %1752 = vst [vmem:[#allocation5] sm:$0xff] %v1744_v51  ;;  %v1745_v13 = vadd.f32 %v1737_v12, %v1072_v16  ;;  %v1740_v28 = vmax.f32 %v1655_v10, 0.0  ;;  %v1657_v43 = vadd.f32 %v1656_v24, %v1410_v29  ;;  %v1727_v54 = vpop.f32.mrf.mxu1 }
 0x601   :  { %v1738_v38 = vmax.f32 %v1726_v56, 0.0  ;;  %v1728_v37 = vadd.f32 %v1727_v54, %v1405_v49 }
 0x602   :  { %1753 = vst [vmem:[#allocation5 + $0x8] sm:$0xff] %v1745_v13  ;;  %v1748_v19 = vadd.f32 %v1740_v28, %v1075_v25  ;;  %v1741_v34 = vmax.f32 %v1657_v43, 0.0  ;;  %v1731_v11 = vpop.f32.mrf.mxu1 }
 0x603   :  { %v1746_v62 = vadd.f32 %v1738_v38, %v1073_v31  ;;  %v1739_v15 = vmax.f32 %v1728_v37, 0.0  ;;  %v1732_v5 = vadd.f32 %v1731_v11, %v1410_v29  ;;  %v3007_v31 = vmax.f32 %v2592_v32, 0.0 }
 0x604   :  { %1756 = vst [vmem:[#allocation5 + $0x20] sm:$0xff] %v1748_v19  ;;  %v1749_v48 = vadd.f32 %v1741_v34, %v1076_v40  ;;  %v1733_v16 = vpop.f32.mrf.mxu1 }
 0x605   :  { %1754 = vst [vmem:[#allocation5 + $0x10] sm:$0xff] %v1746_v62  ;;  %v1747_v57 = vadd.f32 %v1739_v15, %v1074_v7  ;;  %v1742_v23 = vmax.f32 %v1732_v5, 0.0  ;;  %v1734_v18 = vadd.f32 %v1733_v16, %v1410_v29 }
 0x606   :  { %1757 = vst [vmem:[#allocation5 + $0x28] sm:$0xff] %v1749_v48 }
 0x607   :  { %1755 = vst [vmem:[#allocation5 + $0x18] sm:$0xff] %v1747_v57  ;;  %v1750_v1 = vadd.f32 %v1742_v23, %v1077_v60  ;;  %v1743_v22 = vmax.f32 %v1734_v18, 0.0 }
 0x609   :  { %1758 = vst [vmem:[#allocation5 + $0x30] sm:$0xff] %v1750_v1  ;;  %v1751_v39 = vadd.f32 %v1743_v22, %v3007_v31 }
 0x60b   :  { %1759 = vst [vmem:[#allocation5 + $0x38] sm:$0xff] %v1751_v39 }
 0x60c   :  { %1847 = shalt.err (!%p1844_p9)
}
 0x60d   :  { %1771 = dma.vmem_to_hbm [thread:$0]  %s1766_s30, 1024, %s2942_s10, [#allocation4], %s1861_s16, %s1861_s16, %s1862_s17  }
 0x60e   :  { %1858 = dma.done.wait [#allocation4], 1024  }
 0x60f   :  { %1859 = vsyncadd [#allocation4], 4294966272 }
 0x610   :  { %1775 = vsyncpa [#allocation3], 1 }
 0x611   :  { %1776 = vsyncpa [#allocation4], 1 }

</bundles_post_ra>
